<compile_context>
chip_gen: v7x
topology: tpu7x:2x2x1
jax: 0.10.0
libtpu: 0.0.40
codegen_flags: <defaults>
</compile_context>

<pallas_src>
import functools
import numpy as np
import jax
import jax.numpy as jnp
from jax.experimental import pallas as pl
from jax.experimental.pallas import tpu as pltpu


def _layer_norm(x, gamma, beta, eps=1e-5):
    mean = jnp.mean(x, axis=-1, keepdims=True)
    var = jnp.mean((x - mean) ** 2, axis=-1, keepdims=True)
    return (x - mean) * jax.lax.rsqrt(var + eps) * gamma + beta


def attention_block_kernel(x_ref, wqkv_ref, wo_ref, w1_ref, w2_ref, pv_ref,
                           o_ref, *, num_heads, seq_len):
    x = x_ref[...]                                   # (rows, H) f32, rows = b_blk * S
    rows, H = x.shape
    nh = num_heads
    hd = H // nh
    b_blk = rows // seq_len

    # --- packed small vector params: one (8, 4H) lane-dense block ---
    pv = pv_ref[...]
    b_qkv = pv[0:1, :3 * H]                          # Q part already pre-scaled by 1/sqrt(hd)
    b_o = pv[1:2, :H]
    g1 = pv[2:3, :H]
    be1 = pv[3:4, :H]
    b_f1 = pv[4:5, :]
    b_f2 = pv[5:6, :H]
    g2 = pv[6:7, :H]
    be2 = pv[7:8, :H]

    # --- fused QKV projection over all folded rows (scale folded into weight offline) ---
    qkv = jnp.dot(x, wqkv_ref[...], preferred_element_type=jnp.float32) + b_qkv

    # --- one relayout per tensor to head-batched layout (b_blk*nh, S, hd) ---
    def to_heads(t):
        t = t.reshape(b_blk, seq_len, nh, hd)
        t = jnp.transpose(t, (0, 2, 1, 3))           # (b_blk, nh, S, hd)
        return t.reshape(b_blk * nh, seq_len, hd)

    q = to_heads(qkv[:, :H])
    k = to_heads(qkv[:, H:2 * H])
    v = to_heads(qkv[:, 2 * H:])

    # --- per-(sequence, head) attention: batched contractions, no mask needed ---
    s = jnp.einsum('bqd,bkd->bqk', q, k, preferred_element_type=jnp.float32)
    s = s - jnp.max(s, axis=-1, keepdims=True)
    p = jnp.exp(s)
    p = p * pl.reciprocal(jnp.sum(p, axis=-1, keepdims=True), approx=True)
    ctx = jnp.einsum('bqk,bkd->bqd', p, v, preferred_element_type=jnp.float32)

    # --- back to (rows, H) row-major head-interleaved layout ---
    ctx = ctx.reshape(b_blk, nh, seq_len, hd)
    ctx = jnp.transpose(ctx, (0, 2, 1, 3)).reshape(rows, H)

    # --- output projection + residual + LayerNorm 1 ---
    attn = jnp.dot(ctx, wo_ref[...], preferred_element_type=jnp.float32) + b_o
    x1 = _layer_norm(x + attn, g1, be1)

    # --- feedforward: Linear(H,4H) -> ReLU -> Linear(4H,H) ---
    ff = jnp.dot(x1, w1_ref[...], preferred_element_type=jnp.float32) + b_f1
    ff = jnp.maximum(ff, 0.0)
    ff = jnp.dot(ff, w2_ref[...], preferred_element_type=jnp.float32) + b_f2

    # --- residual + LayerNorm 2 ---
    o_ref[...] = _layer_norm(x1 + ff, g2, be2)


def prepare_params(params, num_heads):
    """One-time parameter prep (parameter-load time, not per forward call)."""
    H = params["out_proj_weight"].shape[0]
    hd = H // num_heads
    scale = 1.0 / float(np.sqrt(hd))

    # PyTorch (out, in) Linear weights -> (in, out) so the kernel computes x @ W.
    wqkv_t = jnp.asarray(params["in_proj_weight"], jnp.float32).T    # (H, 3H)
    wqkv_t = wqkv_t.at[:, :H].multiply(scale)                        # fold 1/sqrt(hd) into Q cols
    b_qkv = jnp.asarray(params["in_proj_bias"], jnp.float32)
    b_qkv = b_qkv.at[:H].multiply(scale)

    wo_t = jnp.asarray(params["out_proj_weight"], jnp.float32).T     # (H, H)
    w1_t = jnp.asarray(params["ff1_weight"], jnp.float32).T          # (H, 4H)
    w2_t = jnp.asarray(params["ff2_weight"], jnp.float32).T          # (4H, H)

    # Pack the 9 small vectors into one lane-dense (8, 4H) operand (zero-padded rows).
    def row(v):
        v = jnp.asarray(v, jnp.float32)
        r = jnp.zeros((4 * H,), jnp.float32)
        return r.at[:v.shape[0]].set(v)

    pvec = jnp.stack([
        row(b_qkv),                      # 0: (3H,) QKV bias (Q part pre-scaled)
        row(params["out_proj_bias"]),    # 1: (H,)
        row(params["norm1_weight"]),     # 2
        row(params["norm1_bias"]),       # 3
        row(params["ff1_bias"]),         # 4: (4H,)
        row(params["ff2_bias"]),         # 5
        row(params["norm2_weight"]),     # 6
        row(params["norm2_bias"]),       # 7
    ])                                   # (8, 4H)

    return {"wqkv_t": wqkv_t, "wo_t": wo_t, "w1_t": w1_t, "w2_t": w2_t,
            "pvec": pvec, "num_heads": num_heads}


def attention_module_forward(x, prep):
    num_heads = prep["num_heads"]
    B, S, H = x.shape
    rows_total = B * S
    x2 = x.reshape(rows_total, H).astype(jnp.float32)

    # Batch-block / grid heuristic:
    #  * one big block (grid=(1,)) unless there is enough work to give each of v7x's two
    #    TensorCores >=128-row blocks; the "parallel" grid axis is then sharded across cores.
    #  * (8,128) guard: a partial block's row count must be a multiple of 8.
    target_rows = 128
    b_blk = B
    if S <= target_rows and B * S >= 2 * target_rows:
        b_blk = max(1, target_rows // S)
        while B % b_blk:
            b_blk -= 1
        if (b_blk * S) % 8 != 0:
            b_blk = B
    rows_blk = b_blk * S
    n_steps = B // b_blk

    wqkv_t, wo_t = prep["wqkv_t"], prep["wo_t"]
    w1_t, w2_t, pvec = prep["w1_t"], prep["w2_t"], prep["pvec"]

    def weight_spec(arr):
        idx = lambda i: (0,) * arr.ndim
        if n_steps > 1:
            # Constant-index weight operands: keep a single resident copy (no double-buffer).
            return pl.BlockSpec(arr.shape, idx, pipeline_mode=pl.Buffered(1))
        return pl.BlockSpec(arr.shape, idx)

    kernel = functools.partial(attention_block_kernel,
                               num_heads=num_heads, seq_len=S)

    # VMEM per step (x/out blocks, weights, (b_blk*nh,S,S) scores, (rows,4H) FFN temp) is far
    # below the 32 MiB default scoped limit at these shapes; re-derive and set vmem_limit_bytes
    # explicitly if rows_blk or H is scaled up (v7x has only 64 MiB physical VMEM).
    out2 = pl.pallas_call(
        kernel,
        out_shape=jax.ShapeDtypeStruct((rows_total, H), jnp.float32),
        grid_spec=pltpu.PrefetchScalarGridSpec(
            num_scalar_prefetch=0,
            grid=(n_steps,),
            in_specs=[
                pl.BlockSpec((rows_blk, H), lambda i: (i, 0)),
                weight_spec(wqkv_t),
                weight_spec(wo_t),
                weight_spec(w1_t),
                weight_spec(w2_t),
                weight_spec(pvec),
            ],
            out_specs=pl.BlockSpec((rows_blk, H), lambda i: (i, 0)),
        ),
        compiler_params=pltpu.CompilerParams(dimension_semantics=("parallel",)),
    )(x2, wqkv_t, wo_t, w1_t, w2_t, pvec)
    return out2.reshape(B, S, H)


def reference_forward(x, params, num_heads=4):
    """Pure-JAX reference matching nn.MultiheadAttention + LayerNorm + FFN."""
    B, S, H = x.shape
    hd = H // num_heads
    scale = 1.0 / np.sqrt(hd)
    qkv = x @ params["in_proj_weight"].T + params["in_proj_bias"]
    q, k, v = qkv[..., :H], qkv[..., H:2 * H], qkv[..., 2 * H:]

    def split(t):  # (B,S,H) -> (B,nh,S,hd)
        return t.reshape(B, S, num_heads, hd).transpose(0, 2, 1, 3)

    q, k, v = split(q), split(k), split(v)
    s = jnp.einsum("bhqd,bhkd->bhqk", q, k) * scale
    p = jax.nn.softmax(s, axis=-1)
    o = jnp.einsum("bhqk,bhkd->bhqd", p, v).transpose(0, 2, 1, 3).reshape(B, S, H)
    o = o @ params["out_proj_weight"].T + params["out_proj_bias"]

    def ln(t, g, b):
        m = jnp.mean(t, axis=-1, keepdims=True)
        va = jnp.mean((t - m) ** 2, axis=-1, keepdims=True)
        return (t - m) / jnp.sqrt(va + 1e-5) * g + b

    x1 = ln(x + o, params["norm1_weight"], params["norm1_bias"])
    ff = jnp.maximum(x1 @ params["ff1_weight"].T + params["ff1_bias"], 0.0)
    ff = ff @ params["ff2_weight"].T + params["ff2_bias"]
    return ln(x1 + ff, params["norm2_weight"], params["norm2_bias"])


if __name__ == "__main__":
    hidden_size = 32
    num_heads = 4
    B, S, H = 2, 8, hidden_size

    key = jax.random.PRNGKey(0)
    keys = jax.random.split(key, 12)

    params = {
        "in_proj_weight": 0.05 * jax.random.normal(keys[0], (3 * H, H), jnp.float32),
        "in_proj_bias": 0.01 * jax.random.normal(keys[1], (3 * H,), jnp.float32),
        "out_proj_weight": 0.05 * jax.random.normal(keys[2], (H, H), jnp.float32),
        "out_proj_bias": 0.01 * jax.random.normal(keys[3], (H,), jnp.float32),
        "norm1_weight": jnp.ones((H,), jnp.float32) + 0.02 * jax.random.normal(keys[4], (H,), jnp.float32),
        "norm1_bias": 0.01 * jax.random.normal(keys[5], (H,), jnp.float32),
        "norm2_weight": jnp.ones((H,), jnp.float32) + 0.02 * jax.random.normal(keys[6], (H,), jnp.float32),
        "norm2_bias": 0.01 * jax.random.normal(keys[7], (H,), jnp.float32),
        "ff1_weight": 0.05 * jax.random.normal(keys[8], (4 * H, H), jnp.float32),
        "ff1_bias": 0.01 * jax.random.normal(keys[9], (4 * H,), jnp.float32),
        "ff2_weight": 0.05 * jax.random.normal(keys[10], (H, 4 * H), jnp.float32),
        "ff2_bias": 0.01 * jax.random.normal(keys[11], (H,), jnp.float32),
    }

    x = jax.random.normal(jax.random.PRNGKey(1), (B, S, H), jnp.float32)

    prep = prepare_params(params, num_heads)           # one-time prep, outside the forward path
    out = attention_module_forward(x, prep)
    out = jax.block_until_ready(out)

    ref = jax.block_until_ready(reference_forward(x, params, num_heads=num_heads))
    assert out.shape == (B, S, H)
    np.testing.assert_allclose(np.asarray(out), np.asarray(ref), atol=2e-3, rtol=2e-3)

    print("KERNEL_OK")
</pallas_src>

<mosaic_0001>
module attributes {stable_mosaic.version = 11 : i64} {
  func.func @attention_block_kernel(%arg0: i32, %arg1: memref<16x32xf32, #tpu.memory_space<vmem>>, %arg2: memref<32x96xf32, #tpu.memory_space<vmem>>, %arg3: memref<32x32xf32, #tpu.memory_space<vmem>>, %arg4: memref<32x128xf32, #tpu.memory_space<vmem>>, %arg5: memref<128x32xf32, #tpu.memory_space<vmem>>, %arg6: memref<8x128xf32, #tpu.memory_space<vmem>>, %arg7: memref<16x32xf32, #tpu.memory_space<vmem>>) attributes {dimension_semantics = [#tpu.dimension_semantics<parallel>], iteration_bounds = array<i64: 1>, scalar_prefetch = 0 : i64, scratch_operands = 0 : i64, tpu.core_type = #tpu.core_type<tc>, window_params = [{transform_indices = @transform_0, window_bounds = array<i64: 16, 32>}, {pipeline_mode = #tpu.pipeline_mode<synchronous>, transform_indices = @transform_1, window_bounds = array<i64: 32, 96>}, {pipeline_mode = #tpu.pipeline_mode<synchronous>, transform_indices = @transform_2, window_bounds = array<i64: 32, 32>}, {pipeline_mode = #tpu.pipeline_mode<synchronous>, transform_indices = @transform_3, window_bounds = array<i64: 32, 128>}, {pipeline_mode = #tpu.pipeline_mode<synchronous>, transform_indices = @transform_4, window_bounds = array<i64: 128, 32>}, {pipeline_mode = #tpu.pipeline_mode<synchronous>, transform_indices = @transform_5, window_bounds = array<i64: 8, 128>}, {transform_indices = @transform_6, window_bounds = array<i64: 16, 32>}]} {
    %c0 = arith.constant 0 : index
    %c0_0 = arith.constant 0 : index
    %0 = vector.load %arg1[%c0, %c0_0] : memref<16x32xf32, #tpu.memory_space<vmem>>, vector<16x32xf32>
    %c0_1 = arith.constant 0 : index
    %c0_2 = arith.constant 0 : index
    %1 = vector.load %arg6[%c0_1, %c0_2] : memref<8x128xf32, #tpu.memory_space<vmem>>, vector<8x128xf32>
    %2 = vector.extract_strided_slice %1 {offsets = [0, 0], sizes = [1, 96], strides = [1, 1]} : vector<8x128xf32> to vector<1x96xf32>
    %3 = vector.extract_strided_slice %1 {offsets = [1, 0], sizes = [1, 32], strides = [1, 1]} : vector<8x128xf32> to vector<1x32xf32>
    %4 = vector.extract_strided_slice %1 {offsets = [2, 0], sizes = [1, 32], strides = [1, 1]} : vector<8x128xf32> to vector<1x32xf32>
    %5 = vector.extract_strided_slice %1 {offsets = [3, 0], sizes = [1, 32], strides = [1, 1]} : vector<8x128xf32> to vector<1x32xf32>
    %6 = vector.extract_strided_slice %1 {offsets = [4, 0], sizes = [1, 128], strides = [1, 1]} : vector<8x128xf32> to vector<1x128xf32>
    %7 = vector.extract_strided_slice %1 {offsets = [5, 0], sizes = [1, 32], strides = [1, 1]} : vector<8x128xf32> to vector<1x32xf32>
    %8 = vector.extract_strided_slice %1 {offsets = [6, 0], sizes = [1, 32], strides = [1, 1]} : vector<8x128xf32> to vector<1x32xf32>
    %9 = vector.extract_strided_slice %1 {offsets = [7, 0], sizes = [1, 32], strides = [1, 1]} : vector<8x128xf32> to vector<1x32xf32>
    %c0_3 = arith.constant 0 : index
    %c0_4 = arith.constant 0 : index
    %10 = vector.load %arg2[%c0_3, %c0_4] : memref<32x96xf32, #tpu.memory_space<vmem>>, vector<32x96xf32>
    %cst = arith.constant dense<0.000000e+00> : vector<16x96xf32>
    %11 = tpu.matmul %0, %10, %cst {dimension_numbers = #tpu.dot_dimension_numbers<[1], [0], [0], [1], [0, 0, 1, 1], [], []>} : vector<16x32xf32>, vector<32x96xf32>, vector<16x96xf32> -> vector<16x96xf32>
    %12 = vector.broadcast %2 : vector<1x96xf32> to vector<16x96xf32>
    %13 = arith.addf %11, %12 : vector<16x96xf32>
    %14 = vector.extract_strided_slice %13 {offsets = [0, 0], sizes = [16, 32], strides = [1, 1]} : vector<16x96xf32> to vector<16x32xf32>
    %15 = vector.shape_cast %14 : vector<16x32xf32> to vector<2x8x4x8xf32>
    %16 = tpu.transpose %15, [0, 2, 1, 3] : vector<2x8x4x8xf32> -> vector<2x4x8x8xf32>
    %17 = vector.shape_cast %16 : vector<2x4x8x8xf32> to vector<8x8x8xf32>
    %18 = vector.extract_strided_slice %13 {offsets = [0, 32], sizes = [16, 32], strides = [1, 1]} : vector<16x96xf32> to vector<16x32xf32>
    %19 = vector.shape_cast %18 : vector<16x32xf32> to vector<2x8x4x8xf32>
    %20 = tpu.transpose %19, [0, 2, 1, 3] : vector<2x8x4x8xf32> -> vector<2x4x8x8xf32>
    %21 = vector.shape_cast %20 : vector<2x4x8x8xf32> to vector<8x8x8xf32>
    %22 = vector.extract_strided_slice %13 {offsets = [0, 64], sizes = [16, 32], strides = [1, 1]} : vector<16x96xf32> to vector<16x32xf32>
    %23 = vector.shape_cast %22 : vector<16x32xf32> to vector<2x8x4x8xf32>
    %24 = tpu.transpose %23, [0, 2, 1, 3] : vector<2x8x4x8xf32> -> vector<2x4x8x8xf32>
    %25 = vector.shape_cast %24 : vector<2x4x8x8xf32> to vector<8x8x8xf32>
    "tpu.trace_start"() <{level = 10 : i32, message = "bqd,bkd->bqk"}> : () -> ()
    %cst_5 = arith.constant dense<0.000000e+00> : vector<8x8x8xf32>
    %26 = tpu.matmul %17, %21, %cst_5 {dimension_numbers = #tpu.dot_dimension_numbers<[2], [2], [1], [1], [0, 0, 0, 1, 1, 1], [0], [0]>} : vector<8x8x8xf32>, vector<8x8x8xf32>, vector<8x8x8xf32> -> vector<8x8x8xf32>
    "tpu.trace_stop"() : () -> ()
    %cst_6 = arith.constant dense<0xFF800000> : vector<8x8xf32>
    %27 = vector.multi_reduction <maximumf>, %26, %cst_6 [2] : vector<8x8x8xf32> to vector<8x8xf32>
    %28 = vector.shape_cast %27 : vector<8x8xf32> to vector<8x8x1xf32>
    %29 = vector.broadcast %28 : vector<8x8x1xf32> to vector<8x8x8xf32>
    %30 = arith.subf %26, %29 : vector<8x8x8xf32>
    %31 = math.exp %30 : vector<8x8x8xf32>
    %cst_7 = arith.constant dense<0.000000e+00> : vector<8x8xf32>
    %32 = vector.multi_reduction <add>, %31, %cst_7 [2] : vector<8x8x8xf32> to vector<8x8xf32>
    %33 = vector.shape_cast %32 : vector<8x8xf32> to vector<8x8x1xf32>
    %34 = tpu.reciprocal %33 {approx = true} : vector<8x8x1xf32> -> vector<8x8x1xf32>
    %35 = vector.broadcast %34 : vector<8x8x1xf32> to vector<8x8x8xf32>
    %36 = arith.mulf %31, %35 : vector<8x8x8xf32>
    "tpu.trace_start"() <{level = 10 : i32, message = "bqk,bkd->bqd"}> : () -> ()
    %cst_8 = arith.constant dense<0.000000e+00> : vector<8x8x8xf32>
    %37 = tpu.matmul %36, %25, %cst_8 {dimension_numbers = #tpu.dot_dimension_numbers<[2], [1], [1], [2], [0, 0, 0, 1, 1, 2], [0], [0]>} : vector<8x8x8xf32>, vector<8x8x8xf32>, vector<8x8x8xf32> -> vector<8x8x8xf32>
    "tpu.trace_stop"() : () -> ()
    %38 = vector.shape_cast %37 : vector<8x8x8xf32> to vector<2x4x8x8xf32>
    %39 = tpu.transpose %38, [0, 2, 1, 3] : vector<2x4x8x8xf32> -> vector<2x8x4x8xf32>
    %40 = vector.shape_cast %39 : vector<2x8x4x8xf32> to vector<16x32xf32>
    %c0_9 = arith.constant 0 : index
    %c0_10 = arith.constant 0 : index
    %41 = vector.load %arg3[%c0_9, %c0_10] : memref<32x32xf32, #tpu.memory_space<vmem>>, vector<32x32xf32>
    %cst_11 = arith.constant dense<0.000000e+00> : vector<16x32xf32>
    %42 = tpu.matmul %40, %41, %cst_11 {dimension_numbers = #tpu.dot_dimension_numbers<[1], [0], [0], [1], [0, 0, 1, 1], [], []>} : vector<16x32xf32>, vector<32x32xf32>, vector<16x32xf32> -> vector<16x32xf32>
    %43 = vector.broadcast %3 : vector<1x32xf32> to vector<16x32xf32>
    %44 = arith.addf %42, %43 : vector<16x32xf32>
    %45 = arith.addf %0, %44 : vector<16x32xf32>
    %cst_12 = arith.constant dense<0.000000e+00> : vector<16xf32>
    %46 = vector.multi_reduction <add>, %45, %cst_12 [1] : vector<16x32xf32> to vector<16xf32>
    %47 = vector.shape_cast %46 : vector<16xf32> to vector<16x1xf32>
    %cst_13 = arith.constant 3.200000e+01 : f32
    %48 = vector.broadcast %cst_13 : f32 to vector<16x1xf32>
    %49 = arith.divf %47, %48 : vector<16x1xf32>
    %50 = vector.broadcast %49 : vector<16x1xf32> to vector<16x32xf32>
    %51 = arith.subf %45, %50 : vector<16x32xf32>
    %52 = arith.mulf %51, %51 : vector<16x32xf32>
    %cst_14 = arith.constant dense<0.000000e+00> : vector<16xf32>
    %53 = vector.multi_reduction <add>, %52, %cst_14 [1] : vector<16x32xf32> to vector<16xf32>
    %54 = vector.shape_cast %53 : vector<16xf32> to vector<16x1xf32>
    %cst_15 = arith.constant 3.200000e+01 : f32
    %55 = vector.broadcast %cst_15 : f32 to vector<16x1xf32>
    %56 = arith.divf %54, %55 : vector<16x1xf32>
    %57 = vector.broadcast %49 : vector<16x1xf32> to vector<16x32xf32>
    %58 = arith.subf %45, %57 : vector<16x32xf32>
    %cst_16 = arith.constant 9.99999974E-6 : f32
    %59 = vector.broadcast %cst_16 : f32 to vector<16x1xf32>
    %60 = arith.addf %56, %59 : vector<16x1xf32>
    %61 = math.rsqrt %60 : vector<16x1xf32>
    %62 = vector.broadcast %61 : vector<16x1xf32> to vector<16x32xf32>
    %63 = arith.mulf %58, %62 : vector<16x32xf32>
    %64 = vector.broadcast %4 : vector<1x32xf32> to vector<16x32xf32>
    %65 = arith.mulf %63, %64 : vector<16x32xf32>
    %66 = vector.broadcast %5 : vector<1x32xf32> to vector<16x32xf32>
    %67 = arith.addf %65, %66 : vector<16x32xf32>
    %c0_17 = arith.constant 0 : index
    %c0_18 = arith.constant 0 : index
    %68 = vector.load %arg4[%c0_17, %c0_18] : memref<32x128xf32, #tpu.memory_space<vmem>>, vector<32x128xf32>
    %cst_19 = arith.constant dense<0.000000e+00> : vector<16x128xf32>
    %69 = tpu.matmul %67, %68, %cst_19 {dimension_numbers = #tpu.dot_dimension_numbers<[1], [0], [0], [1], [0, 0, 1, 1], [], []>} : vector<16x32xf32>, vector<32x128xf32>, vector<16x128xf32> -> vector<16x128xf32>
    %70 = vector.broadcast %6 : vector<1x128xf32> to vector<16x128xf32>
    %71 = arith.addf %69, %70 : vector<16x128xf32>
    %cst_20 = arith.constant 0.000000e+00 : f32
    %72 = vector.broadcast %cst_20 : f32 to vector<16x128xf32>
    %73 = arith.maximumf %71, %72 : vector<16x128xf32>
    %c0_21 = arith.constant 0 : index
    %c0_22 = arith.constant 0 : index
    %74 = vector.load %arg5[%c0_21, %c0_22] : memref<128x32xf32, #tpu.memory_space<vmem>>, vector<128x32xf32>
    %cst_23 = arith.constant dense<0.000000e+00> : vector<16x32xf32>
    %75 = tpu.matmul %73, %74, %cst_23 {dimension_numbers = #tpu.dot_dimension_numbers<[1], [0], [0], [1], [0, 0, 1, 1], [], []>} : vector<16x128xf32>, vector<128x32xf32>, vector<16x32xf32> -> vector<16x32xf32>
    %76 = vector.broadcast %7 : vector<1x32xf32> to vector<16x32xf32>
    %77 = arith.addf %75, %76 : vector<16x32xf32>
    %78 = arith.addf %67, %77 : vector<16x32xf32>
    %cst_24 = arith.constant dense<0.000000e+00> : vector<16xf32>
    %79 = vector.multi_reduction <add>, %78, %cst_24 [1] : vector<16x32xf32> to vector<16xf32>
    %80 = vector.shape_cast %79 : vector<16xf32> to vector<16x1xf32>
    %cst_25 = arith.constant 3.200000e+01 : f32
    %81 = vector.broadcast %cst_25 : f32 to vector<16x1xf32>
    %82 = arith.divf %80, %81 : vector<16x1xf32>
    %83 = vector.broadcast %82 : vector<16x1xf32> to vector<16x32xf32>
    %84 = arith.subf %78, %83 : vector<16x32xf32>
    %85 = arith.mulf %84, %84 : vector<16x32xf32>
    %cst_26 = arith.constant dense<0.000000e+00> : vector<16xf32>
    %86 = vector.multi_reduction <add>, %85, %cst_26 [1] : vector<16x32xf32> to vector<16xf32>
    %87 = vector.shape_cast %86 : vector<16xf32> to vector<16x1xf32>
    %cst_27 = arith.constant 3.200000e+01 : f32
    %88 = vector.broadcast %cst_27 : f32 to vector<16x1xf32>
    %89 = arith.divf %87, %88 : vector<16x1xf32>
    %90 = vector.broadcast %82 : vector<16x1xf32> to vector<16x32xf32>
    %91 = arith.subf %78, %90 : vector<16x32xf32>
    %cst_28 = arith.constant 9.99999974E-6 : f32
    %92 = vector.broadcast %cst_28 : f32 to vector<16x1xf32>
    %93 = arith.addf %89, %92 : vector<16x1xf32>
    %94 = math.rsqrt %93 : vector<16x1xf32>
    %95 = vector.broadcast %94 : vector<16x1xf32> to vector<16x32xf32>
    %96 = arith.mulf %91, %95 : vector<16x32xf32>
    %97 = vector.broadcast %8 : vector<1x32xf32> to vector<16x32xf32>
    %98 = arith.mulf %96, %97 : vector<16x32xf32>
    %99 = vector.broadcast %9 : vector<1x32xf32> to vector<16x32xf32>
    %100 = arith.addf %98, %99 : vector<16x32xf32>
    %c0_29 = arith.constant 0 : index
    %c0_30 = arith.constant 0 : index
    %101 = vector.load %arg7[%c0_29, %c0_30] : memref<16x32xf32, #tpu.memory_space<vmem>>, vector<16x32xf32>
    tpu.vector_store %arg7[%c0_29, %c0_30], %100 {strides = array<i32>} : memref<16x32xf32, #tpu.memory_space<vmem>>, vector<16x32xf32>,
    return
  }
  func.func @transform_0(%arg0: i32) -> (i32, i32) {
    %c0_i32 = arith.constant 0 : i32
    %c0_i32_0 = arith.constant 0 : i32
    return %arg0, %c0_i32 : i32, i32
  }
  func.func @transform_1(%arg0: i32) -> (i32, i32) {
    %c0_i32 = arith.constant 0 : i32
    %c0_i32_0 = arith.constant 0 : i32
    %c0_i32_1 = arith.constant 0 : i32
    return %c0_i32, %c0_i32_0 : i32, i32
  }
  func.func @transform_2(%arg0: i32) -> (i32, i32) {
    %c0_i32 = arith.constant 0 : i32
    %c0_i32_0 = arith.constant 0 : i32
    %c0_i32_1 = arith.constant 0 : i32
    return %c0_i32, %c0_i32_0 : i32, i32
  }
  func.func @transform_3(%arg0: i32) -> (i32, i32) {
    %c0_i32 = arith.constant 0 : i32
    %c0_i32_0 = arith.constant 0 : i32
    %c0_i32_1 = arith.constant 0 : i32
    return %c0_i32, %c0_i32_0 : i32, i32
  }
  func.func @transform_4(%arg0: i32) -> (i32, i32) {
    %c0_i32 = arith.constant 0 : i32
    %c0_i32_0 = arith.constant 0 : i32
    %c0_i32_1 = arith.constant 0 : i32
    return %c0_i32, %c0_i32_0 : i32, i32
  }
  func.func @transform_5(%arg0: i32) -> (i32, i32) {
    %c0_i32 = arith.constant 0 : i32
    %c0_i32_0 = arith.constant 0 : i32
    %c0_i32_1 = arith.constant 0 : i32
    return %c0_i32, %c0_i32_0 : i32, i32
  }
  func.func @transform_6(%arg0: i32) -> (i32, i32) {
    %c0_i32 = arith.constant 0 : i32
    %c0_i32_0 = arith.constant 0 : i32
    return %arg0, %c0_i32 : i32, i32
  }
}

</mosaic_0001>

<bundles_post_ra>
// kernel: tpu_custom_call.1
= control target key start
LH: loop header
LB: loop body
LE: loop exit
PB: predicated region body
PF: predicated region fallthrough
CT: control target
= control target key end

     0   :  { %vm35_vm0 = vcmask 261120   ;;  %s3934_s0 = inlined_call_operand.vmem [shape: f32[16,32], index: 0, kind: input, shape index: {}]   ;;  %s3935_s1 = inlined_call_operand.vmem [shape: f32[32,96], index: 1, kind: input, shape index: {}]   ;;  %s3936_s2 = inlined_call_operand.vmem [shape: f32[32,32], index: 2, kind: input, shape index: {}]   ;;  %s3937_s3 = inlined_call_operand.vmem [shape: f32[32,128], index: 3, kind: input, shape index: {}]   ;;  %s3938_s4 = inlined_call_operand.vmem [shape: f32[128,32], index: 4, kind: input, shape index: {}]   ;;  %s3939_s5 = inlined_call_operand.vmem [shape: f32[8,128], index: 5, kind: input, shape index: {}]   ;;  %s3940_s6 = inlined_call_operand.hbm [shape: f32[16,32], index: 6, kind: output, shape index: {}]  }
   0x1   :  { %v27_v0 = vld [vmem:[%s3935_s1] sm:$0xff]  ;;  %v28_v1 = vld [vmem:[%s3935_s1 + $0x8] sm:$0xff]  ;;  %v29_v2 = vld [vmem:[%s3935_s1 + $0x10] sm:$0xff] }
   0x2   :  { %v3222_v3 = vpack.c.bf16 %v28_v1, %v27_v0  ;;  %v30_v4 = vld [vmem:[%s3935_s1 + $0x18] sm:$0xff]  ;;  %v24_v5 = vld [vmem:[%s3934_s0] sm:$0xff] }
   0x3   :  { %v3226_v6 = vpack.c.bf16 %v30_v4, %v29_v2  ;;  %3082 = vmatprep.mubr.msk.f32.mxu1 %vm35_vm0, %v24_v5 }
   0x4   :  { %11 = vsyncpa [#allocation3], 0  ;;  %3223 = vmatprep.subr.bf16.mxu1 %v3222_v3  ;;  %v25_v7 = vld [vmem:[%s3934_s0 + $0x8] sm:$0xff]  ;;  %v31_v8 = vlaneseq  ;;  %v26_v11 = vld [vmem:[%s3939_s5] sm:$0xff]  ;;  %s3359_s10 = smov 104   ;;  %s3360_s11 = smov 120  }
   0x5   :  { %3225 = vmatpush3.bf16.msra.mxu1 %v3222_v3  ;;  %s3361_s12 = smov 112   ;;  %s3362_s13 = smov 96   ;;  %v3364_v23 = vmov 0.0   ;;  %vm3365_vm1 = vmmov 0   ;;  %v3366_v24 = vmov 1983009808  }
   0x6   :  { %3227 = vmatprep.subr.bf16.mxu1 %v3226_v6  ;;  %v3428_v9 = vshrl.u32 %v31_v8, 7  ;;  %s3363_s14 = smov 64   ;;  %3095 = vmatprep.subr.mxu0 %v3364_v23  ;;  %v140_v25 = vunpack.c.l.s4 %v3366_v24  ;;  %v3367_v27 = vmov 1934713408   ;;  %vm1001_vm2 = vcmask 64512   ;;  %s3368_s15 = smov 8  }
   0x7   :  { %3097 = vmatprep.mubr.msk.f32.mxu0 %vm3365_vm1, %v3364_v23  ;;  %v172_v28 = vunpack.c.l.s4 %v3367_v27  ;;  %s3369_s16 = smov 16   ;;  %s3370_s17 = smov 24   ;;  %vm2580_vm3 = vcmask 130048   ;;  %vm2583_vm4 = vcmask 195584  }
   0x8   :  { %v33_v10 = vsub.s32 0, %v3428_v9  ;;  %v141_v26 = vunpack.c.0.s8 %v140_v25 }
   0x9   :  { %3229 = vmatpush3.bf16.msra.mxu1 %v3226_v6  ;;  %v173_v33 = vunpack.c.0.s8 %v172_v28 }
   0xa   :  { %v34_v12 = vrot.slane %v26_v11, %v33_v10  ;;  %3085 = vmatprep.subr.mxu1 %v3364_v23  ;;  %v3467_v30 = vsub.s32 %v141_v26, %v3428_v9 }
   0xb   :  { %v3478_v38 = vsub.s32 %v173_v33, %v3428_v9 }
   0xc   :  { %3083 = vmatmul.mubr.msk.f32.vlgmr.msra.gmra.mrb[0].mxu1 %vm35_vm0, %v25_v7 }
   0xd   :  { %3087 = vmatprep.mubr.msk.f32.mxu1 %vm3365_vm1, %v3364_v23 }
  0xdf   :  { %v3084_v13 = vpop.f32.mrb[0].mxu1 }
  0xe0   :  { %v108_v14 = vpop.f32.mrb[1].mxu1  ;;  %v3434_v16 = vadd.f32 %v3084_v13, %v34_v12 }
  0xe1   :  { %v109_v15 = vadd.f32 %v108_v14, %v34_v12 }
  0xe3   :  { %131 = vrot.lane.b32.xlu1 %v109_v15, %s3359_s10  ;;  %119 = vrot.lane.b32.xlu0 %v109_v15, %s3360_s11 }
  0xe7   :  { %121 = vrot.lane.b32.xlu1 %v3434_v16, %s3360_s11  ;;  %125 = vrot.lane.b32.xlu0 %v109_v15, %s3361_s12 }
  0xeb   :  { %133 = vrot.lane.b32.xlu1 %v3434_v16, %s3359_s10  ;;  %127 = vrot.lane.b32.xlu0 %v3434_v16, %s3361_s12 }
  0xef   :  { %409 = vrot.lane.b32.xlu0 %v109_v15, %s3362_s13 }
 0x155   :  { %v3439_v17 = vpop.permute.xlu1 %131  ;;  %v3441_v18 = vpop.permute.xlu0 %119 }
 0x156   :  { %413 = vrot.lane.b32.xlu1 %v3441_v18, %s3362_s13  ;;  %v153_v31 = vcombine.low %v3441_v18, %v3439_v17  ;;  %v154_v34 = vcombine.high %v3441_v18, %v3439_v17 }
 0x158   :  { %v161_v36 = vrot.slane %v153_v31, %v3467_v30  ;;  %v168_v39 = vrot.slane %v154_v34, %v3467_v30 }
 0x159   :  { %v3444_v19 = vpop.permute.xlu0 %125  ;;  %v3448_v20 = vpop.permute.xlu1 %121 }
 0x15a   :  { %421 = vrot.lane.b32.xlu1 %v3439_v17, %s3362_s13  ;;  %417 = vrot.lane.b32.xlu0 %v3444_v19, %s3362_s13  ;;  %v137_v29 = vcombine.low %v109_v15, %v3444_v19  ;;  %v138_v32 = vcombine.high %v109_v15, %v3444_v19 }
 0x15c   :  { %v145_v35 = vrot.slane %v137_v29, %v3467_v30  ;;  %v152_v37 = vrot.slane %v138_v32, %v3467_v30 }
 0x15d   :  { %v3452_v21 = vpop.permute.xlu1 %133  ;;  %v3454_v22 = vpop.permute.xlu0 %127 }
 0x15e   :  { %415 = vrot.lane.b32.xlu1 %v3448_v20, %s3362_s13  ;;  %411 = vrot.lane.b32.xlu0 %v3434_v16, %s3362_s13  ;;  %v169_v40 = vcombine.low %v145_v35, %v161_v36  ;;  %v170_v41 = vcombine.high %v145_v35, %v161_v36  ;;  %v221_v42 = vcombine.low %v3448_v20, %v3452_v21 }
 0x15f   :  { %v205_v43 = vcombine.low %v3434_v16, %v3454_v22  ;;  %v185_v44 = vcombine.low %v152_v37, %v168_v39  ;;  %v186_v45 = vcombine.high %v152_v37, %v168_v39  ;;  %v222_v46 = vcombine.high %v3448_v20, %v3452_v21 }
 0x160   :  { %v206_v47 = vcombine.high %v3434_v16, %v3454_v22  ;;  %v177_v48 = vrot.slane %v169_v40, %v3478_v38  ;;  %v184_v49 = vrot.slane %v170_v41, %v3478_v38  ;;  %v229_v50 = vrot.slane %v221_v42, %v3467_v30 }
 0x161   :  { %v213_v51 = vrot.slane %v205_v43, %v3467_v30  ;;  %v193_v52 = vrot.slane %v185_v44, %v3478_v38  ;;  %v200_v53 = vrot.slane %v186_v45, %v3478_v38  ;;  %v236_v54 = vrot.slane %v222_v46, %v3467_v30  ;;  %v410_v0 = vpop.permute.xlu0 %409 }
 0x162   :  { %423 = vrot.lane.b32.xlu1 %v3452_v21, %s3362_s13  ;;  %419 = vrot.lane.b32.xlu0 %v3454_v22, %s3362_s13  ;;  %v220_v55 = vrot.slane %v206_v47, %v3467_v30  ;;  %v273_v56 = vcombine.low %v177_v48, %v184_v49  ;;  %v2962_v57 = vcombine.high %v177_v48, %v184_v49 }
 0x163   :  { %v237_v58 = vcombine.low %v213_v51, %v229_v50  ;;  %v238_v59 = vcombine.high %v213_v51, %v229_v50  ;;  %v289_v60 = vcombine.low %v193_v52, %v200_v53  ;;  %v2963_v61 = vcombine.high %v193_v52, %v200_v53 }
 0x164   :  { %v253_v62 = vcombine.low %v220_v55, %v236_v54  ;;  %v254_v63 = vcombine.high %v220_v55, %v236_v54  ;;  %v3498_v2 = vrot.slane %v273_v56, %v3467_v30  ;;  %v3501_v3 = vrot.slane %v2962_v57, %v3467_v30 }
 0x165   :  { %v245_v4 = vrot.slane %v237_v58, %v3478_v38  ;;  %v252_v5 = vrot.slane %v238_v59, %v3478_v38  ;;  %v3506_v6 = vrot.slane %v289_v60, %v3467_v30  ;;  %v3509_v7 = vrot.slane %v2963_v61, %v3467_v30 }
 0x166   :  { %705 = vrot.lane.b32.xlu1 %v109_v15, %s3363_s14  ;;  %v261_v8 = vrot.slane %v253_v62, %v3478_v38  ;;  %v268_v10 = vrot.slane %v254_v63, %v3478_v38  ;;  %v305_v27 = vcombine.low %v3498_v2, %v3501_v3  ;;  %v306_v46 = vcombine.high %v3498_v2, %v3501_v3 }
 0x167   :  { %v341_v25 = vcombine.low %v245_v4, %v252_v5  ;;  %v2964_v26 = vcombine.high %v245_v4, %v252_v5  ;;  %v321_v36 = vcombine.low %v3506_v6, %v3509_v7  ;;  %v322_v55 = vcombine.high %v3506_v6, %v3509_v7 }
 0x168   :  { %v357_v33 = vcombine.low %v261_v8, %v268_v10  ;;  %v2965_v34 = vcombine.high %v261_v8, %v268_v10  ;;  %v3528_v45 = vrot.slane %v305_v27, %v3478_v38 }
 0x169   :  { %v3522_v43 = vrot.slane %v341_v25, %v3467_v30  ;;  %v3525_v44 = vrot.slane %v2964_v26, %v3467_v30  ;;  %v3543_v54 = vrot.slane %v321_v36, %v3478_v38 }
 0x16a   :  { %v3537_v51 = vrot.slane %v357_v33, %v3467_v30  ;;  %v3540_v52 = vrot.slane %v2965_v34, %v3467_v30 }
 0x1c8   :  { %v414_v1 = vpop.permute.xlu1 %413 }
 0x1cc   :  { %v422_v11 = vpop.permute.xlu1 %421  ;;  %v418_v12 = vpop.permute.xlu0 %417 }
 0x1cd   :  { %v449_v13 = vcombine.low %v414_v1, %v422_v11  ;;  %v450_v14 = vcombine.high %v414_v1, %v422_v11  ;;  %v433_v15 = vcombine.low %v410_v0, %v418_v12  ;;  %v434_v24 = vcombine.high %v410_v0, %v418_v12 }
 0x1cf   :  { %v457_v28 = vrot.slane %v449_v13, %v3467_v30  ;;  %v464_v29 = vrot.slane %v450_v14, %v3467_v30  ;;  %v441_v31 = vrot.slane %v433_v15, %v3467_v30  ;;  %v448_v32 = vrot.slane %v434_v24, %v3467_v30 }
 0x1d0   :  { %v416_v35 = vpop.permute.xlu1 %415  ;;  %v412_v42 = vpop.permute.xlu0 %411 }
 0x1d1   :  { %v465_v37 = vcombine.low %v441_v31, %v457_v28  ;;  %v466_v39 = vcombine.high %v441_v31, %v457_v28  ;;  %v481_v40 = vcombine.low %v448_v32, %v464_v29  ;;  %v482_v41 = vcombine.high %v448_v32, %v464_v29 }
 0x1d3   :  { %v473_v47 = vrot.slane %v465_v37, %v3478_v38  ;;  %v480_v48 = vrot.slane %v466_v39, %v3478_v38  ;;  %v489_v49 = vrot.slane %v481_v40, %v3478_v38  ;;  %v496_v50 = vrot.slane %v482_v41, %v3478_v38 }
 0x1d4   :  { %v424_v53 = vpop.permute.xlu1 %423  ;;  %v420_v60 = vpop.permute.xlu0 %419  ;;  %v320_v37 = vrot.slane %v306_v46, %v3478_v38  ;;  %v336_v39 = vrot.slane %v322_v55, %v3478_v38 }
 0x1d5   :  { %v569_v56 = vcombine.low %v473_v47, %v480_v48  ;;  %v2966_v57 = vcombine.high %v473_v47, %v480_v48  ;;  %v585_v58 = vcombine.low %v489_v49, %v496_v50  ;;  %v2967_v59 = vcombine.high %v489_v49, %v496_v50 }
 0x1d6   :  { %v517_v61 = vcombine.low %v416_v35, %v424_v53  ;;  %v518_v62 = vcombine.high %v416_v35, %v424_v53  ;;  %v501_v63 = vcombine.low %v412_v42, %v420_v60  ;;  %v502_v0 = vcombine.high %v412_v42, %v420_v60 }
 0x1d7   :  { %v576_v1 = vrot.slane %v569_v56, %v3467_v30  ;;  %v584_v2 = vrot.slane %v2966_v57, %v3467_v30  ;;  %v592_v3 = vrot.slane %v585_v58, %v3467_v30  ;;  %v600_v4 = vrot.slane %v2967_v59, %v3467_v30 }
 0x1d8   :  { %v525_v5 = vrot.slane %v517_v61, %v3467_v30  ;;  %v532_v6 = vrot.slane %v518_v62, %v3467_v30  ;;  %v509_v7 = vrot.slane %v501_v63, %v3467_v30  ;;  %v516_v8 = vrot.slane %v502_v0, %v3467_v30 }
 0x1d9   :  { %v601_v10 = vcombine.low %v576_v1, %v584_v2  ;;  %v617_v11 = vcombine.low %v592_v3, %v600_v4  ;;  %v602_v12 = vcombine.high %v576_v1, %v584_v2  ;;  %v618_v13 = vcombine.high %v592_v3, %v600_v4 }
 0x1da   :  { %v533_v14 = vcombine.low %v509_v7, %v525_v5  ;;  %v534_v15 = vcombine.high %v509_v7, %v525_v5  ;;  %v549_v24 = vcombine.low %v516_v8, %v532_v6  ;;  %v550_v25 = vcombine.high %v516_v8, %v532_v6 }
 0x1db   :  { %v609_v26 = vrot.slane %v601_v10, %v3478_v38  ;;  %v625_v27 = vrot.slane %v617_v11, %v3478_v38  ;;  %v616_v28 = vrot.slane %v602_v12, %v3478_v38  ;;  %v632_v29 = vrot.slane %v618_v13, %v3478_v38 }
 0x1dc   :  { %v541_v31 = vrot.slane %v533_v14, %v3478_v38  ;;  %v548_v32 = vrot.slane %v534_v15, %v3478_v38  ;;  %v557_v33 = vrot.slane %v549_v24, %v3478_v38  ;;  %v564_v34 = vrot.slane %v550_v25, %v3478_v38 }
 0x1dd   :  { %v633_v35 = vcombine.low %v609_v26, %v625_v27  ;;  %v635_v36 = vcombine.low %v616_v28, %v632_v29  ;;  %v337_v48 = vcombine.low %v3528_v45, %v3543_v54  ;;  %v339_v55 = vcombine.low %v320_v37, %v336_v39 }
 0x1de   :  { %v637_v40 = vcombine.low %v541_v31, %v548_v32  ;;  %v2968_v41 = vcombine.high %v541_v31, %v548_v32  ;;  %v653_v42 = vcombine.low %v557_v33, %v564_v34  ;;  %v2969_v47 = vcombine.high %v557_v33, %v564_v34 }
 0x1df   :  { %3086 = vmatpush3.xpose.msk.msra.mxu1 %vm1001_vm2, %v633_v35  ;;  %3096 = vmatpush3.xpose.msk.msra.mxu0 %vm1001_vm2, %v635_v36  ;;  %v634_v56 = vcombine.high %v609_v26, %v625_v27  ;;  %v373_v57 = vcombine.low %v3522_v43, %v3525_v44  ;;  %v389_v58 = vcombine.low %v3537_v51, %v3540_v52 }
 0x1e0   :  { %v644_v49 = vrot.slane %v637_v40, %v3467_v30  ;;  %v652_v50 = vrot.slane %v2968_v41, %v3467_v30  ;;  %v660_v53 = vrot.slane %v653_v42, %v3467_v30  ;;  %v668_v46 = vrot.slane %v2969_v47, %v3467_v30  ;;  %3090 = vmatprep.subr.mxu1 %v3364_v23 }
 0x1e1   :  { %3105 = vmatprep.subr.mxu0 %v3364_v23  ;;  %v374_v63 = vcombine.high %v3522_v43, %v3525_v44  ;;  %v338_v0 = vcombine.high %v3528_v45, %v3543_v54  ;;  %v636_v3 = vcombine.high %v616_v28, %v632_v29  ;;  %v381_v4 = vrot.slane %v373_v57, %v3478_v38 }
 0x1e2   :  { %v669_v59 = vcombine.low %v644_v49, %v652_v50  ;;  %v670_v60 = vcombine.high %v644_v49, %v652_v50  ;;  %v685_v61 = vcombine.low %v660_v53, %v668_v46  ;;  %v686_v62 = vcombine.high %v660_v53, %v668_v46  ;;  %3088 = vmatmul.mubr.msk.f32.vlgmr.msra.gmra.mrb[2].mxu1 %vm1001_vm2, %v337_v48 }
 0x1e3   :  { %3098 = vmatmul.mubr.msk.f32.vlgmr.msra.gmra.mrb[0].mxu0 %vm1001_vm2, %v339_v55  ;;  %3091 = vmatpush3.xpose.msk.msra.mxu1 %vm1001_vm2, %v634_v56  ;;  %v397_v43 = vrot.slane %v389_v58, %v3478_v38  ;;  %v390_v44 = vcombine.high %v3537_v51, %v3540_v52  ;;  %v340_v6 = vcombine.high %v320_v37, %v336_v39  ;;  %v706_v55 = vpop.permute.xlu1 %705 }
 0x1e4   :  { %3092 = vmatprep.mubr.msk.f32.mxu1 %vm3365_vm1, %v3364_v23  ;;  %3100 = vmatprep.subr.mxu1 %v3364_v23  ;;  %v677_v1 = vrot.slane %v669_v59, %v3478_v38  ;;  %v693_v2 = vrot.slane %v685_v61, %v3478_v38  ;;  %v684_v54 = vrot.slane %v670_v60, %v3478_v38 }
 0x1e5   :  { %3107 = vmatprep.mubr.msk.f32.mxu0 %vm3365_vm1, %v3364_v23  ;;  %v700_v5 = vrot.slane %v686_v62, %v3478_v38  ;;  %v405_v7 = vcombine.low %v381_v4, %v397_v43  ;;  %v388_v52 = vrot.slane %v374_v63, %v3478_v38  ;;  %v404_v8 = vrot.slane %v390_v44, %v3478_v38 }
 0x1e6   :  { %3093 = vmatmul.mubr.msk.f32.vlgmr.msra.gmra.mrb[4].mxu1 %vm1001_vm2, %v338_v0  ;;  %v701_v45 = vcombine.low %v677_v1, %v693_v2  ;;  %v702_v51 = vcombine.high %v677_v1, %v693_v2  ;;  %v406_v11 = vcombine.high %v381_v4, %v397_v43 }
 0x1e7   :  { %3101 = vmatpush3.xpose.msk.msra.mxu1 %vm1001_vm2, %v636_v3  ;;  %3102 = vmatprep.mubr.msk.f32.mxu1 %vm3365_vm1, %v3364_v23  ;;  %v703_v10 = vcombine.low %v684_v54, %v700_v5  ;;  %v407_v12 = vcombine.low %v388_v52, %v404_v8  ;;  %v704_v13 = vcombine.high %v684_v54, %v700_v5 }
 0x1e8   :  { %3106 = vmatpush3.xpose.msk.msra.mxu0 %vm1001_vm2, %v701_v45  ;;  %3110 = vmatprep.subr.mxu1 %v3364_v23  ;;  %v408_v14 = vcombine.high %v388_v52, %v404_v8 }
 0x1e9   :  { %3115 = vmatprep.subr.mxu0 %v3364_v23 }
 0x1ea   :  { %3103 = vmatmul.mubr.msk.f32.vlgmr.msra.gmra.mrb[6].mxu1 %vm1001_vm2, %v340_v6 }
 0x1eb   :  { %3108 = vmatmul.mubr.msk.f32.vlgmr.msra.gmra.mrb[2].mxu0 %vm1001_vm2, %v405_v7  ;;  %3111 = vmatpush3.xpose.msk.msra.mxu1 %vm1001_vm2, %v702_v51 }
 0x1ec   :  { %3116 = vmatpush3.xpose.msk.msra.mxu0 %vm1001_vm2, %v703_v10  ;;  %3112 = vmatprep.mubr.msk.f32.mxu1 %vm3365_vm1, %v3364_v23 }
 0x1ed   :  { %3117 = vmatprep.mubr.msk.f32.mxu0 %vm3365_vm1, %v3364_v23  ;;  %3120 = vmatprep.subr.mxu1 %v3364_v23 }
 0x1ee   :  { %3113 = vmatmul.mubr.msk.f32.vlgmr.msra.gmra.mrb[8].mxu1 %vm1001_vm2, %v406_v11  ;;  %3125 = vmatprep.subr.mxu0 %v3364_v23 }
 0x1ef   :  { %3118 = vmatmul.mubr.msk.f32.vlgmr.msra.gmra.mrb[4].mxu0 %vm1001_vm2, %v407_v12  ;;  %3121 = vmatpush3.xpose.msk.msra.mxu1 %vm1001_vm2, %v704_v13 }
 0x1f0   :  { %3122 = vmatprep.mubr.msk.f32.mxu1 %vm3365_vm1, %v3364_v23  ;;  %3130 = vmatprep.subr.mxu1 %v3364_v23 }
 0x1f1   :  { %3127 = vmatprep.mubr.msk.f32.mxu0 %vm3365_vm1, %v3364_v23 }
 0x1f2   :  { %3123 = vmatmul.mubr.msk.f32.vlgmr.msra.gmra.mrb[10].mxu1 %vm1001_vm2, %v408_v14 }
 0x1f3   :  { %3132 = vmatprep.mubr.msk.f32.mxu1 %vm3365_vm1, %v3364_v23 }
 0x2b5   :  { %v1074_v15 = vpop.f32.mrb[2].mxu1 }
 0x2b6   :  { %v1226_v24 = vpop.f32.mrb[0].mxu0  ;;  %v3089_v25 = vpop.f32.mrb[3].mxu1  ;;  %v1610_v26 = vsel %vm1001_vm2, %v1074_v15, -inf }
 0x2b7   :  { %v3099_v27 = vpop.f32.mrb[1].mxu0  ;;  %1611 = vmax.xlane.f32.xlu0 %v1610_v26  ;;  %v1616_v31 = vsel %vm1001_vm2, %v1226_v24, -inf }
 0x2b9   :  { %v1150_v28 = vpop.f32.mrb[4].mxu1 }
 0x2ba   :  { %v3094_v29 = vpop.f32.mrb[5].mxu1  ;;  %v1613_v32 = vsel %vm1001_vm2, %v1150_v28, -inf }
 0x2bb   :  { %1617 = vmax.xlane.f32.xlu0 %v1616_v31  ;;  %1614 = vmax.xlane.f32.xlu1 %v1613_v32 }
 0x2bd   :  { %v1302_v33 = vpop.f32.mrb[6].mxu1 }
 0x2be   :  { %v1378_v34 = vpop.f32.mrb[2].mxu0  ;;  %v3104_v35 = vpop.f32.mrb[7].mxu1  ;;  %v1619_v36 = vsel %vm1001_vm2, %v1302_v33, -inf }
 0x2bf   :  { %v3109_v37 = vpop.f32.mrb[3].mxu0  ;;  %1620 = vmax.xlane.f32.xlu0 %v1619_v36  ;;  %v1622_v39 = vsel %vm1001_vm2, %v1378_v34, -inf }
 0x2c0   :  { %1623 = vmax.xlane.f32.xlu1 %v1622_v39 }
 0x2c1   :  { %v1454_v40 = vpop.f32.mrb[8].mxu1 }
 0x2c2   :  { %v1530_v41 = vpop.f32.mrb[4].mxu0  ;;  %v3114_v42 = vpop.f32.mrb[9].mxu1  ;;  %v1625_v47 = vsel %vm1001_vm2, %v1454_v40, -inf }
 0x2c3   :  { %v3119_v48 = vpop.f32.mrb[5].mxu0  ;;  %1626 = vmax.xlane.f32.xlu0 %v1625_v47  ;;  %v1628_v49 = vsel %vm1001_vm2, %v1530_v41, -inf }
 0x2c4   :  { %1629 = vmax.xlane.f32.xlu1 %v1628_v49 }
 0x2c5   :  { %v1606_v50 = vpop.f32.mrb[10].mxu1 }
 0x2c6   :  { %v3124_v53 = vpop.f32.mrb[11].mxu1  ;;  %v1631_v46 = vsel %vm1001_vm2, %v1606_v50, -inf }
 0x2c7   :  { %1632 = vmax.xlane.f32.xlu0 %v1631_v46 }
 0x2d5   :  { %713 = vrot.lane.b32.xlu1 %v3444_v19, %s3363_s14 }
 0x2d9   :  { %717 = vrot.lane.b32.xlu1 %v3439_v17, %s3363_s14 }
 0x2dd   :  { %707 = vrot.lane.b32.xlu1 %v3434_v16, %s3363_s14  ;;  %709 = vrot.lane.b32.xlu0 %v3441_v18, %s3363_s14 }
 0x344   :  { %v1612_v56 = vpop.xlane.xlu0 %1611 }
 0x345   :  { %v1634_v57 = vsub.f32 %v1074_v15, %v1612_v56 }
 0x347   :  { %v1642_v58 = vmul.f32 1.442695, %v1634_v57 }
 0x348   :  { %v1615_v59 = vpop.xlane.xlu1 %1614  ;;  %v1618_v60 = vpop.xlane.xlu0 %1617 }
 0x349   :  { %3292 = vpow2.f32 %v1642_v58  ;;  %v1635_v61 = vsub.f32 %v1150_v28, %v1615_v59  ;;  %v1636_v62 = vsub.f32 %v1226_v24, %v1618_v60 }
 0x34b   :  { %v1644_v63 = vmul.f32 1.442695, %v1635_v61  ;;  %v1646_v19 = vmul.f32 1.442695, %v1636_v62 }
 0x34c   :  { %v1621_v0 = vpop.xlane.xlu0 %1620 }
 0x34d   :  { %3294 = vpow2.f32 %v1644_v63  ;;  %v1624_v17 = vpop.xlane.xlu1 %1623  ;;  %v1637_v1 = vsub.f32 %v1302_v33, %v1621_v0 }
 0x34e   :  { %3296 = vpow2.f32 %v1646_v19  ;;  %v1638_v16 = vsub.f32 %v1378_v34, %v1624_v17 }
 0x34f   :  { %v1648_v3 = vmul.f32 1.442695, %v1637_v1 }
 0x350   :  { %v1650_v2 = vmul.f32 1.442695, %v1638_v16  ;;  %v1627_v18 = vpop.xlane.xlu0 %1626 }
 0x351   :  { %v1630_v4 = vpop.xlane.xlu1 %1629  ;;  %v1639_v43 = vsub.f32 %v1454_v40, %v1627_v18 }
 0x352   :  { %3298 = vpow2.f32 %v1650_v2  ;;  %v1640_v44 = vsub.f32 %v1530_v41, %v1630_v4 }
 0x353   :  { %v3645_v45 = vpop.eup %3292  ;;  %v1652_v54 = vmul.f32 1.442695, %v1639_v43  ;;  %3300 = vpow2.f32 %v1648_v3 }
 0x354   :  { %v1654_v5 = vmul.f32 1.442695, %v1640_v44  ;;  %v1633_v6 = vpop.xlane.xlu0 %1632  ;;  %v1658_v7 = vsel %vm1001_vm2, %v3645_v45, 0.0 }
 0x355   :  { %3302 = vpow2.f32 %v1652_v54  ;;  %v714_v51 = vpop.permute.xlu1 %713  ;;  %v1641_v52 = vsub.f32 %v1606_v50, %v1633_v6  ;;  %1659 = vadd.xlane.f32.xlu1 %v1658_v7 }
 0x356   :  { %v729_v10 = vcombine.low %v706_v55, %v714_v51  ;;  %3304 = vpow2.f32 %v1654_v5  ;;  %v730_v12 = vcombine.high %v706_v55, %v714_v51 }
 0x357   :  { %v3649_v8 = vpop.eup %3294  ;;  %v1656_v13 = vmul.f32 1.442695, %v1641_v52 }
 0x358   :  { %v3651_v11 = vpop.eup %3296  ;;  %v710_v14 = vpop.permute.xlu0 %709  ;;  %v1661_v15 = vsel %vm1001_vm2, %v3649_v8, 0.0  ;;  %v737_v28 = vrot.slane %v729_v10, %v3467_v30  ;;  %v744_v31 = vrot.slane %v730_v12, %v3467_v30 }
 0x359   :  { %v718_v24 = vpop.permute.xlu1 %717  ;;  %1662 = vadd.xlane.f32.xlu0 %v1661_v15  ;;  %v1664_v25 = vsel %vm1001_vm2, %v3651_v11, 0.0  ;;  %3306 = vpow2.f32 %v1656_v13 }
 0x35a   :  { %v745_v26 = vcombine.low %v710_v14, %v718_v24  ;;  %v746_v27 = vcombine.high %v710_v14, %v718_v24  ;;  %1665 = vadd.xlane.f32.xlu1 %v1664_v25 }
 0x35c   :  { %v3658_v29 = vpop.eup %3298  ;;  %v753_v32 = vrot.slane %v745_v26, %v3467_v30  ;;  %v760_v33 = vrot.slane %v746_v27, %v3467_v30 }
 0x35d   :  { %v1670_v34 = vsel %vm1001_vm2, %v3658_v29, 0.0  ;;  %v3665_v35 = vpop.eup %3300  ;;  %v708_v7 = vpop.permute.xlu1 %707 }
 0x35e   :  { %v761_v36 = vcombine.low %v737_v28, %v753_v32  ;;  %v762_v37 = vcombine.high %v737_v28, %v753_v32  ;;  %v777_v39 = vcombine.low %v744_v31, %v760_v33  ;;  %v778_v40 = vcombine.high %v744_v31, %v760_v33  ;;  %1671 = vadd.xlane.f32.xlu0 %v1670_v34 }
 0x35f   :  { %v3667_v41 = vpop.eup %3302  ;;  %v1667_v50 = vsel %vm1001_vm2, %v3665_v35, 0.0 }
 0x360   :  { %v769_v42 = vrot.slane %v761_v36, %v3478_v38  ;;  %v776_v47 = vrot.slane %v762_v37, %v3478_v38  ;;  %v785_v48 = vrot.slane %v777_v39, %v3478_v38  ;;  %v792_v49 = vrot.slane %v778_v40, %v3478_v38  ;;  %v3677_v46 = vpop.eup %3304 }
 0x361   :  { %v1673_v53 = vsel %vm1001_vm2, %v3667_v41, 0.0  ;;  %v1676_v63 = vsel %vm1001_vm2, %v3677_v46, 0.0 }
 0x362   :  { %v865_v55 = vcombine.low %v769_v42, %v776_v47  ;;  %v2970_v56 = vcombine.high %v769_v42, %v776_v47  ;;  %v881_v57 = vcombine.low %v785_v48, %v792_v49  ;;  %v2971_v58 = vcombine.high %v785_v48, %v792_v49  ;;  %1668 = vadd.xlane.f32.xlu0 %v1667_v50 }
 0x363   :  { %1674 = vadd.xlane.f32.xlu1 %v1673_v53  ;;  %v3685_v19 = vpop.eup %3306 }
 0x364   :  { %v872_v59 = vrot.slane %v865_v55, %v3467_v30  ;;  %v880_v60 = vrot.slane %v2970_v56, %v3467_v30  ;;  %v888_v61 = vrot.slane %v881_v57, %v3467_v30  ;;  %v896_v62 = vrot.slane %v2971_v58, %v3467_v30 }
 0x365   :  { %v1679_v43 = vsel %vm1001_vm2, %v3685_v19, 0.0 }
 0x366   :  { %1677 = vadd.xlane.f32.xlu0 %v1676_v63  ;;  %v897_v0 = vcombine.low %v872_v59, %v880_v60  ;;  %v913_v17 = vcombine.low %v888_v61, %v896_v62  ;;  %v898_v1 = vcombine.high %v872_v59, %v880_v60  ;;  %v914_v16 = vcombine.high %v888_v61, %v896_v62 }
 0x368   :  { %v905_v2 = vrot.slane %v897_v0, %v3478_v38  ;;  %v921_v3 = vrot.slane %v913_v17, %v3478_v38  ;;  %v912_v18 = vrot.slane %v898_v1, %v3478_v38  ;;  %v928_v4 = vrot.slane %v914_v16, %v3478_v38 }
 0x36a   :  { %1680 = vadd.xlane.f32.xlu0 %v1679_v43  ;;  %v929_v44 = vcombine.low %v905_v2, %v921_v3  ;;  %v930_v54 = vcombine.high %v905_v2, %v921_v3  ;;  %v931_v5 = vcombine.low %v912_v18, %v928_v4  ;;  %v932_v6 = vcombine.high %v912_v18, %v928_v4 }
 0x36c   :  { %3126 = vmatpush3.msra.mxu0 %v929_v44  ;;  %3131 = vmatpush3.msra.mxu1 %v930_v54 }
 0x36d   :  { %3135 = vmatprep.subr.mxu0 %v3364_v23  ;;  %3140 = vmatprep.subr.mxu1 %v3364_v23 }
 0x374   :  { %715 = vrot.lane.b32.xlu1 %v3454_v22, %s3363_s14 }
 0x378   :  { %719 = vrot.lane.b32.xlu1 %v3452_v21, %s3363_s14 }
 0x380   :  { %711 = vrot.lane.b32.xlu0 %v3448_v20, %s3363_s14 }
 0x3e2   :  { %v1660_v51 = vpop.xlane.xlu1 %1659 }
 0x3e3   :  { %3308 = vrcp.f32 %v1660_v51 }
 0x3e6   :  { %v1663_v52 = vpop.xlane.xlu0 %1662 }
 0x3e7   :  { %v1666_v10 = vpop.xlane.xlu1 %1665  ;;  %3310 = vrcp.f32 %v1663_v52 }
 0x3e8   :  { %3312 = vrcp.f32 %v1666_v10 }
 0x3eb   :  { %v1672_v12 = vpop.xlane.xlu0 %1671 }
 0x3ed   :  { %v3309_v13 = vpop.eup %3308 }
 0x3ee   :  { %v1690_v14 = vmul.f32 %v3309_v13, %v3645_v45 }
 0x3ef   :  { %v1669_v15 = vpop.xlane.xlu0 %1668 }
 0x3f0   :  { %v1675_v24 = vpop.xlane.xlu1 %1674  ;;  %3314 = vrcp.f32 %v1669_v15  ;;  %3128 = vmatmul.mubr.msk.f32.vlgmr.msra.gmra.mrb[6].mxu0 %vm1001_vm2, %v1690_v14 }
 0x3f1   :  { %v3311_v21 = vpop.eup %3310  ;;  %3136 = vmatpush3.msra.mxu0 %v931_v5  ;;  %3137 = vmatprep.mubr.msk.f32.mxu0 %vm3365_vm1, %v3364_v23  ;;  %3316 = vrcp.f32 %v1672_v12 }
 0x3f2   :  { %v3313_v20 = vpop.eup %3312  ;;  %v1691_v22 = vmul.f32 %v3311_v21, %v3649_v8  ;;  %3145 = vmatprep.subr.mxu0 %v3364_v23  ;;  %3318 = vrcp.f32 %v1675_v24 }
 0x3f3   :  { %v1692_v25 = vmul.f32 %v3313_v20, %v3651_v11  ;;  %v1678_v26 = vpop.xlane.xlu0 %1677 }
 0x3f4   :  { %3133 = vmatmul.mubr.msk.f32.vlgmr.msra.gmra.mrb[12].mxu1 %vm1001_vm2, %v1691_v22  ;;  %v716_v45 = vpop.permute.xlu1 %715  ;;  %3320 = vrcp.f32 %v1678_v26 }
 0x3f5   :  { %3138 = vmatmul.mubr.msk.f32.vlgmr.msra.gmra.mrb[8].mxu0 %vm1001_vm2, %v1692_v25  ;;  %3141 = vmatpush3.msra.mxu1 %v932_v6  ;;  %v797_v28 = vcombine.low %v708_v7, %v716_v45  ;;  %v798_v31 = vcombine.high %v708_v7, %v716_v45 }
 0x3f6   :  { %3142 = vmatprep.mubr.msk.f32.mxu1 %vm3365_vm1, %v3364_v23  ;;  %3150 = vmatprep.subr.mxu1 %v3364_v23 }
 0x3f7   :  { %v1681_v27 = vpop.xlane.xlu0 %1680  ;;  %3147 = vmatprep.mubr.msk.f32.mxu0 %vm3365_vm1, %v3364_v23  ;;  %v805_v37 = vrot.slane %v797_v28, %v3467_v30  ;;  %v812_v39 = vrot.slane %v798_v31, %v3467_v30 }
 0x3f8   :  { %v720_v32 = vpop.permute.xlu1 %719  ;;  %3322 = vrcp.f32 %v1681_v27 }
 0x3fa   :  { %v3315_v8 = vpop.eup %3314 }
 0x3fb   :  { %v1693_v11 = vmul.f32 %v3315_v8, %v3665_v35  ;;  %v712_v33 = vpop.permute.xlu0 %711  ;;  %v3317_v17 = vpop.eup %3316 }
 0x3fc   :  { %v813_v34 = vcombine.low %v712_v33, %v720_v32  ;;  %v814_v36 = vcombine.high %v712_v33, %v720_v32  ;;  %v3319_v18 = vpop.eup %3318  ;;  %v1694_v52 = vmul.f32 %v3317_v17, %v3658_v29 }
 0x3fd   :  { %3143 = vmatmul.mubr.msk.f32.vlgmr.msra.gmra.mrb[14].mxu1 %vm1001_vm2, %v1693_v11  ;;  %v1695_v10 = vmul.f32 %v3319_v18, %v3667_v41 }
 0x3fe   :  { %v821_v40 = vrot.slane %v813_v34, %v3467_v30  ;;  %v828_v42 = vrot.slane %v814_v36, %v3467_v30  ;;  %3152 = vmatprep.mubr.msk.f32.mxu1 %vm3365_vm1, %v3364_v23  ;;  %v3321_v44 = vpop.eup %3320 }
 0x3ff   :  { %v1696_v14 = vmul.f32 %v3321_v44, %v3677_v46 }
 0x400   :  { %v829_v35 = vcombine.low %v805_v37, %v821_v40  ;;  %v830_v47 = vcombine.high %v805_v37, %v821_v40  ;;  %v845_v48 = vcombine.low %v812_v39, %v828_v42  ;;  %v846_v49 = vcombine.high %v812_v39, %v828_v42 }
 0x402   :  { %v837_v50 = vrot.slane %v829_v35, %v3478_v38  ;;  %v844_v53 = vrot.slane %v830_v47, %v3478_v38  ;;  %v853_v55 = vrot.slane %v845_v48, %v3478_v38  ;;  %v860_v56 = vrot.slane %v846_v49, %v3478_v38  ;;  %v3323_v51 = vpop.eup %3322 }
 0x403   :  { %v1697_v15 = vmul.f32 %v3323_v51, %v3685_v19 }
 0x404   :  { %v933_v57 = vcombine.low %v837_v50, %v844_v53  ;;  %v2972_v58 = vcombine.high %v837_v50, %v844_v53  ;;  %v949_v59 = vcombine.low %v853_v55, %v860_v56  ;;  %v2973_v60 = vcombine.high %v853_v55, %v860_v56 }
 0x406   :  { %v940_v61 = vrot.slane %v933_v57, %v3467_v30  ;;  %v948_v62 = vrot.slane %v2972_v58, %v3467_v30  ;;  %v956_v63 = vrot.slane %v949_v59, %v3467_v30  ;;  %v964_v0 = vrot.slane %v2973_v60, %v3467_v30 }
 0x408   :  { %v965_v1 = vcombine.low %v940_v61, %v948_v62  ;;  %v981_v16 = vcombine.low %v956_v63, %v964_v0  ;;  %v966_v2 = vcombine.high %v940_v61, %v948_v62  ;;  %v982_v3 = vcombine.high %v956_v63, %v964_v0 }
 0x40a   :  { %v973_v4 = vrot.slane %v965_v1, %v3478_v38  ;;  %v989_v43 = vrot.slane %v981_v16, %v3478_v38  ;;  %v980_v54 = vrot.slane %v966_v2, %v3478_v38  ;;  %v996_v5 = vrot.slane %v982_v3, %v3478_v38 }
 0x40c   :  { %v997_v6 = vcombine.low %v973_v4, %v989_v43  ;;  %v998_v7 = vcombine.high %v973_v4, %v989_v43  ;;  %v999_v12 = vcombine.low %v980_v54, %v996_v5  ;;  %v1000_v13 = vcombine.high %v980_v54, %v996_v5 }
 0x40e   :  { %3146 = vmatpush3.msra.mxu0 %v997_v6  ;;  %3151 = vmatpush3.msra.mxu1 %v998_v7 }
 0x40f   :  { %3148 = vmatmul.mubr.msk.f32.vlgmr.msra.gmra.mrb[10].mxu0 %vm1001_vm2, %v1694_v52  ;;  %3153 = vmatmul.mubr.msk.f32.vlgmr.msra.gmra.mrb[16].mxu1 %vm1001_vm2, %v1695_v10 }
 0x410   :  { %3155 = vmatprep.subr.mxu0 %v3364_v23  ;;  %3160 = vmatprep.subr.mxu1 %v3364_v23 }
 0x411   :  { %3156 = vmatpush3.msra.mxu0 %v999_v12  ;;  %3161 = vmatpush3.msra.mxu1 %v1000_v13 }
 0x412   :  { %3157 = vmatprep.mubr.msk.f32.mxu0 %vm3365_vm1, %v3364_v23  ;;  %3162 = vmatprep.mubr.msk.f32.mxu1 %vm3365_vm1, %v3364_v23 }
 0x413   :  { %3158 = vmatmul.mubr.msk.f32.vlgmr.msra.gmra.mrb[12].mxu0 %vm1001_vm2, %v1696_v14  ;;  %3163 = vmatmul.mubr.msk.f32.vlgmr.msra.gmra.mrb[18].mxu1 %vm1001_vm2, %v1697_v15 }
 0x4c3   :  { %v1767_v29 = vpop.f32.mrb[6].mxu0 }
 0x4c4   :  { %v3129_v41 = vpop.f32.mrb[7].mxu0 }
 0x4c7   :  { %v1840_v24 = vpop.f32.mrb[12].mxu1 }
 0x4c8   :  { %v1913_v21 = vpop.f32.mrb[8].mxu0  ;;  %v3134_v20 = vpop.f32.mrb[13].mxu1 }
 0x4c9   :  { %v2282_v46 = vcombine.low %v1767_v29, %v1913_v21  ;;  %v2283_v22 = vcombine.high %v1767_v29, %v1913_v21  ;;  %v3139_v19 = vpop.f32.mrb[9].mxu0  ;;  %v2586_v21 = vld [vmem:[%s3936_s2] sm:$0xff]  ;;  %v2587_v20 = vld [vmem:[%s3936_s2 + $0x8] sm:$0xff] }
 0x4cb   :  { %v2290_v8 = vrot.slane %v2282_v46, %v3467_v30  ;;  %v2297_v23 = vrot.slane %v2283_v22, %v3467_v30 }
 0x4d0   :  { %v1986_v25 = vpop.f32.mrb[14].mxu1 }
 0x4d1   :  { %v2298_v26 = vcombine.low %v1840_v24, %v1986_v25  ;;  %v2299_v45 = vcombine.high %v1840_v24, %v1986_v25  ;;  %v3144_v27 = vpop.f32.mrb[15].mxu1 }
 0x4d3   :  { %v2306_v28 = vrot.slane %v2298_v26, %v3467_v30  ;;  %v2313_v31 = vrot.slane %v2299_v45, %v3467_v30  ;;  %v3230_v26 = vpack.c.bf16 %v2587_v20, %v2586_v21 }
 0x4d5   :  { %v2314_v11 = vcombine.low %v2290_v8, %v2306_v28  ;;  %v2315_v32 = vcombine.high %v2290_v8, %v2306_v28  ;;  %v2330_v33 = vcombine.low %v2297_v23, %v2313_v31  ;;  %v2331_v34 = vcombine.high %v2297_v23, %v2313_v31  ;;  %3231 = vmatprep.subr.bf16.mxu1 %v3230_v26  ;;  %v2588_v28 = vld [vmem:[%s3936_s2 + $0x10] sm:$0xff]  ;;  %v2589_v31 = vld [vmem:[%s3936_s2 + $0x18] sm:$0xff] }
 0x4d6   :  { %3233 = vmatpush3.bf16.msra.mxu1 %v3230_v26  ;;  %v2719_v26 = vld [vmem:[%s3937_s3 + $0x18] sm:$0xff] }
 0x4d7   :  { %v2322_v36 = vrot.slane %v2314_v11, %v3478_v38  ;;  %v2329_v37 = vrot.slane %v2315_v32, %v3478_v38  ;;  %v2338_v39 = vrot.slane %v2330_v33, %v3478_v38  ;;  %v2345_v40 = vrot.slane %v2331_v34, %v3478_v38 }
 0x4d9   :  { %v2418_v42 = vcombine.low %v2322_v36, %v2329_v37  ;;  %v2998_v35 = vcombine.high %v2322_v36, %v2329_v37  ;;  %v2434_v47 = vcombine.low %v2338_v39, %v2345_v40  ;;  %v2999_v48 = vcombine.high %v2338_v39, %v2345_v40 }
 0x4da   :  { %v3234_v36 = vpack.c.bf16 %v2589_v31, %v2588_v28  ;;  %v2810_v31 = vld [vmem:[%s3938_s4 + $0x18] sm:$0xff] }
 0x4db   :  { %v2425_v49 = vrot.slane %v2418_v42, %v3467_v30  ;;  %v2433_v50 = vrot.slane %v2998_v35, %v3467_v30  ;;  %v2441_v53 = vrot.slane %v2434_v47, %v3467_v30  ;;  %v2449_v55 = vrot.slane %v2999_v48, %v3467_v30 }
 0x4dc   :  { %3235 = vmatprep.subr.bf16.mxu1 %v3234_v36 }
 0x4dd   :  { %v2450_v56 = vcombine.low %v2425_v49, %v2433_v50  ;;  %v2466_v57 = vcombine.low %v2441_v53, %v2449_v55  ;;  %v2451_v58 = vcombine.high %v2425_v49, %v2433_v50  ;;  %v2467_v59 = vcombine.high %v2441_v53, %v2449_v55  ;;  %3237 = vmatpush3.bf16.msra.mxu1 %v3234_v36  ;;  %v2813_v36 = vld [vmem:[%s3938_s4 + $0x30] sm:$0xff] }
 0x4df   :  { %v3762_v60 = vrot.slane %v2450_v56, %v3478_v38  ;;  %v3765_v61 = vrot.slane %v2466_v57, %v3478_v38  ;;  %v2465_v62 = vrot.slane %v2451_v58, %v3478_v38  ;;  %v2481_v63 = vrot.slane %v2467_v59, %v3478_v38 }
 0x4e1   :  { %v2483_v0 = vcombine.high %v3762_v60, %v3765_v61  ;;  %v2484_v17 = vcombine.low %v2465_v62, %v2481_v63  ;;  %v2485_v1 = vcombine.high %v2465_v62, %v2481_v63  ;;  %v2482_v16 = vcombine.low %v3762_v60, %v3765_v61  ;;  %v3818_v60 = vld [vmem:[%s3939_s5] sm:$0xff] }
 0x4e2   :  { %v2059_v2 = vpop.f32.mrb[10].mxu0  ;;  %v2132_v3 = vpop.f32.mrb[16].mxu1 }
 0x4e3   :  { %2556 = vrot.lane.b32.xlu0 %v2483_v0, %s3368_s15  ;;  %v3149_v18 = vpop.f32.mrb[11].mxu0  ;;  %v3154_v4 = vpop.f32.mrb[17].mxu1 }
 0x4e4   :  { %v2592_v18 = vsub.s32 1, %v3428_v9 }
 0x4e6   :  { %v2205_v43 = vpop.f32.mrb[12].mxu0  ;;  %v2278_v44 = vpop.f32.mrb[18].mxu1  ;;  %v2593_v61 = vrot.slane %v3818_v60, %v2592_v18 }
 0x4e7   :  { %v2350_v54 = vcombine.low %v2059_v2, %v2205_v43  ;;  %v2351_v5 = vcombine.high %v2059_v2, %v2205_v43  ;;  %v2366_v6 = vcombine.low %v2132_v3, %v2278_v44  ;;  %v2367_v7 = vcombine.high %v2132_v3, %v2278_v44  ;;  %2564 = vrot.lane.b32.xlu0 %v2484_v17, %s3369_s16  ;;  %v3159_v51 = vpop.f32.mrb[13].mxu0  ;;  %v3164_v52 = vpop.f32.mrb[19].mxu1 }
 0x4e9   :  { %v2358_v10 = vrot.slane %v2350_v54, %v3467_v30  ;;  %v2365_v12 = vrot.slane %v2351_v5, %v3467_v30  ;;  %v2374_v13 = vrot.slane %v2366_v6, %v3467_v30  ;;  %v2381_v14 = vrot.slane %v2367_v7, %v3467_v30  ;;  %v3333_v54 = vld [vmem:[%s3934_s0 + $0x8] sm:$0xff]  ;;  %v3334_v6 = vld [vmem:[%s3934_s0] sm:$0xff] }
 0x4eb   :  { %v2382_v15 = vcombine.low %v2358_v10, %v2374_v13  ;;  %v2383_v29 = vcombine.high %v2358_v10, %v2374_v13  ;;  %v2398_v41 = vcombine.low %v2365_v12, %v2381_v14  ;;  %v2399_v24 = vcombine.high %v2365_v12, %v2381_v14  ;;  %2572 = vrot.lane.b32.xlu0 %v2485_v1, %s3370_s17 }
 0x4ed   :  { %v2390_v46 = vrot.slane %v2382_v15, %v3478_v38  ;;  %v2397_v22 = vrot.slane %v2383_v29, %v3478_v38  ;;  %v2406_v19 = vrot.slane %v2398_v41, %v3478_v38  ;;  %v2413_v25 = vrot.slane %v2399_v24, %v3478_v38 }
 0x4ef   :  { %v2486_v45 = vcombine.low %v2390_v46, %v2397_v22  ;;  %v3000_v27 = vcombine.high %v2390_v46, %v2397_v22  ;;  %v2502_v8 = vcombine.low %v2406_v19, %v2413_v25  ;;  %v3001_v23 = vcombine.high %v2406_v19, %v2413_v25  ;;  %v2716_v46 = vld [vmem:[%s3937_s3] sm:$0xff]  ;;  %v2717_v22 = vld [vmem:[%s3937_s3 + $0x8] sm:$0xff]  ;;  %v2718_v25 = vld [vmem:[%s3937_s3 + $0x10] sm:$0xff] }
 0x4f0   :  { %v3238_v19 = vpack.c.bf16 %v2717_v22, %v2716_v46 }
 0x4f1   :  { %v2493_v11 = vrot.slane %v2486_v45, %v3467_v30  ;;  %v2501_v32 = vrot.slane %v3000_v27, %v3467_v30  ;;  %v2509_v33 = vrot.slane %v2502_v8, %v3467_v30  ;;  %v2517_v34 = vrot.slane %v3001_v23, %v3467_v30  ;;  %v2807_v27 = vld [vmem:[%s3938_s4] sm:$0xff]  ;;  %v2808_v8 = vld [vmem:[%s3938_s4 + $0x8] sm:$0xff]  ;;  %v2809_v23 = vld [vmem:[%s3938_s4 + $0x10] sm:$0xff] }
 0x4f2   :  { %3239 = vmatprep.subr.bf16.mxu1 %v3238_v19  ;;  %v3242_v45 = vpack.c.bf16 %v2719_v26, %v2718_v25  ;;  %v3246_v28 = vpack.c.bf16 %v2808_v8, %v2807_v27 }
 0x4f3   :  { %v2518_v37 = vcombine.low %v2493_v11, %v2501_v32  ;;  %v2534_v39 = vcombine.low %v2509_v33, %v2517_v34  ;;  %v2519_v40 = vcombine.high %v2493_v11, %v2501_v32  ;;  %v2535_v42 = vcombine.high %v2509_v33, %v2517_v34  ;;  %v2811_v32 = vld [vmem:[%s3938_s4 + $0x20] sm:$0xff]  ;;  %v2812_v33 = vld [vmem:[%s3938_s4 + $0x28] sm:$0xff] }
 0x4f4   :  { %v3250_v11 = vpack.c.bf16 %v2810_v31, %v2809_v23  ;;  %3247 = vmatprep.subr.bf16.mxu0 %v3246_v28  ;;  %v3254_v34 = vpack.c.bf16 %v2812_v33, %v2811_v32 }
 0x4f5   :  { %v2526_v35 = vrot.slane %v2518_v37, %v3478_v38  ;;  %v2542_v47 = vrot.slane %v2534_v39, %v3478_v38  ;;  %v2533_v48 = vrot.slane %v2519_v40, %v3478_v38  ;;  %v2549_v49 = vrot.slane %v2535_v42, %v3478_v38  ;;  %3249 = vmatpush3.bf16.msra.mxu0 %v3246_v28  ;;  %v2814_v37 = vld [vmem:[%s3938_s4 + $0x38] sm:$0xff]  ;;  %v2815_v40 = vld [vmem:[%s3938_s4 + $0x40] sm:$0xff]  ;;  %v2816_v42 = vld [vmem:[%s3938_s4 + $0x48] sm:$0xff] }
 0x4f6   :  { %3251 = vmatprep.subr.bf16.mxu0 %v3250_v11  ;;  %v3258_v39 = vpack.c.bf16 %v2814_v37, %v2813_v36 }
 0x4f7   :  { %v2551_v50 = vcombine.high %v2526_v35, %v2542_v47  ;;  %v2552_v53 = vcombine.low %v2533_v48, %v2549_v49  ;;  %v2553_v55 = vcombine.high %v2533_v48, %v2549_v49  ;;  %v2550_v30 = vcombine.low %v2526_v35, %v2542_v47  ;;  %v2817_v47 = vld [vmem:[%s3938_s4 + $0x50] sm:$0xff]  ;;  %v2818_v48 = vld [vmem:[%s3938_s4 + $0x58] sm:$0xff] }
 0x4f8   :  { %v3262_v35 = vpack.c.bf16 %v2816_v42, %v2815_v40  ;;  %v3266_v49 = vpack.c.bf16 %v2818_v48, %v2817_v47  ;;  %v2938_v47 = vsub.s32 7, %v3428_v9 }
 0x4f9   :  { %2558 = vrot.lane.b32.xlu1 %v2551_v50, %s3368_s15  ;;  %3253 = vmatpush3.bf16.msra.mxu0 %v3250_v11  ;;  %v2819_v50 = vld [vmem:[%s3938_s4 + $0x60] sm:$0xff] }
 0x4fa   :  { %3255 = vmatprep.subr.bf16.mxu0 %v3254_v34 }
 0x4fd   :  { %2566 = vrot.lane.b32.xlu1 %v2552_v53, %s3369_s16  ;;  %3257 = vmatpush3.bf16.msra.mxu0 %v3254_v34  ;;  %v2820_v53 = vld [vmem:[%s3938_s4 + $0x68] sm:$0xff] }
 0x4fe   :  { %3259 = vmatprep.subr.bf16.mxu0 %v3258_v39 }
 0x501   :  { %2574 = vrot.lane.b32.xlu1 %v2553_v55, %s3370_s17  ;;  %3261 = vmatpush3.bf16.msra.mxu0 %v3258_v39  ;;  %v3270_v55 = vpack.c.bf16 %v2820_v53, %v2819_v50 }
 0x502   :  { %3263 = vmatprep.subr.bf16.mxu0 %v3262_v35 }
 0x505   :  { %3265 = vmatpush3.bf16.msra.mxu0 %v3262_v35  ;;  %v2932_v35 = vsub.s32 6, %v3428_v9 }
 0x506   :  { %3267 = vmatprep.subr.bf16.mxu0 %v3266_v49 }
 0x507   :  { %v2933_v48 = vrot.slane %v3818_v60, %v2932_v35 }
 0x509   :  { %3269 = vmatpush3.bf16.msra.mxu0 %v3266_v49 }
 0x50a   :  { %3271 = vmatprep.subr.bf16.mxu0 %v3270_v55 }
 0x50d   :  { %3273 = vmatpush3.bf16.msra.mxu0 %v3270_v55  ;;  %v2939_v55 = vrot.slane %v3818_v60, %v2938_v47 }
 0x555   :  { %v2557_v56 = vpop.permute.xlu0 %2556 }
 0x556   :  { %v2578_v38 = vsel %vm1001_vm2, %v2482_v16, %v2557_v56 }
 0x559   :  { %v2565_v57 = vpop.permute.xlu0 %2564 }
 0x55a   :  { %v2581_v58 = vsel %vm2580_vm3, %v2578_v38, %v2565_v57 }
 0x55d   :  { %v2573_v59 = vpop.permute.xlu0 %2572 }
 0x55e   :  { %v2584_v62 = vsel %vm2583_vm4, %v2581_v58, %v2573_v59 }
 0x55f   :  { %3173 = vmatprep.mubr.msk.f32.mxu1 %vm35_vm0, %v2584_v62  ;;  %v2706_v62 = vsub.s32 2, %v3428_v9 }
 0x56b   :  { %v2559_v63 = vpop.permute.xlu1 %2558 }
 0x56c   :  { %v2579_v17 = vsel %vm1001_vm2, %v2550_v30, %v2559_v63  ;;  %v2712_v63 = vsub.s32 3, %v3428_v9 }
 0x56f   :  { %v2567_v0 = vpop.permute.xlu1 %2566 }
 0x570   :  { %v2582_v1 = vsel %vm2580_vm3, %v2579_v17, %v2567_v0  ;;  %v2707_v0 = vrot.slane %v3818_v60, %v2706_v62 }
 0x573   :  { %v2575_v2 = vpop.permute.xlu1 %2574 }
 0x574   :  { %v2585_v3 = vsel %vm2583_vm4, %v2582_v1, %v2575_v2  ;;  %v2713_v2 = vrot.slane %v3818_v60, %v2712_v63 }
 0x575   :  { %3174 = vmatmul.mubr.msk.f32.vlgmr.msra.gmra.mrb[20].mxu1 %vm35_vm0, %v2585_v3 }
 0x576   :  { %3241 = vmatpush3.bf16.msra.mxu1 %v3238_v19 }
 0x577   :  { %3243 = vmatprep.subr.bf16.mxu1 %v3242_v45 }
 0x57a   :  { %3245 = vmatpush3.bf16.msra.mxu1 %v3242_v45 }
 0x648   :  { %v3175_v16 = vpop.f32.mrb[20].mxu1 }
 0x649   :  { %v2672_v4 = vadd.f32 %v3175_v16, %v2593_v61  ;;  %v2666_v43 = vpop.f32.mrb[21].mxu1 }
 0x64a   :  { %v2667_v44 = vadd.f32 %v2666_v43, %v2593_v61 }
 0x64b   :  { %v2676_v5 = vadd.f32 %v3333_v54, %v2672_v4  ;;  %v2822_v54 = vld [vmem:[%s3938_s4 + $0x78] sm:$0xff] }
 0x64c   :  { %v2675_v7 = vadd.f32 %v3334_v6, %v2667_v44  ;;  %v2821_v44 = vld [vmem:[%s3938_s4 + $0x70] sm:$0xff]  ;;  %v2722_v6 = vsub.s32 4, %v3428_v9  ;;  %s3371_s4 = smov [#allocation2]  }
 0x64d   :  { %v2680_v51 = vsel %vm35_vm0, %v2676_v5, 0.0  ;;  %s2949_s17 = sshll.u32 %s3371_s4, 4  ;;  %s2950_s17 = int_to_ptr.vmem [resolvable:$true] %s2949_s17 }
 0x64e   :  { %2681 = vadd.xlane.f32.xlu1 %v2680_v51  ;;  %v2677_v52 = vsel %vm35_vm0, %v2675_v7, 0.0  ;;  %s3335_s18 = scalar_lea.vmem %s2950_s17, 256  ;;  %p3340_p1 = scmp.lt.s32.totalorder %s2950_s17, %s2950_s17 }
 0x64f   :  { %2678 = vadd.xlane.f32.xlu0 %v2677_v52  ;;  %p3336_p0 = scmp.ne.s32.totalorder %s2950_s17, %s3335_s18  ;;  %p3341_p2 = scmp.lt.s32.totalorder %s3335_s18, %s3335_s18 }
 0x651   :  { %p3342_p3 = por %p3341_p2, %p3340_p1 }
 0x653   :  { %p3343_p4 = pnand %p3342_p3, %p3336_p0 }
 0x6db   :  { %v2682_v10 = vpop.xlane.xlu1 %2681 }
 0x6dc   :  { %v2685_v12 = vmul.f32 0.03125, %v2682_v10  ;;  %v2679_v13 = vpop.xlane.xlu0 %2678 }
 0x6dd   :  { %v2684_v14 = vmul.f32 0.03125, %v2679_v13 }
 0x6de   :  { %v3829_v15 = vsub.f32 %v2676_v5, %v2685_v12  ;;  %v3274_v5 = vpack.c.bf16 %v2822_v54, %v2821_v44 }
 0x6df   :  { %v3831_v29 = vsub.f32 %v2675_v7, %v2684_v14  ;;  %v2723_v7 = vrot.slane %v3818_v60, %v2722_v6 }
 0x6e0   :  { %v2689_v21 = vmul.f32 %v3829_v15, %v3829_v15  ;;  %3275 = vmatprep.subr.bf16.mxu0 %v3274_v5 }
 0x6e1   :  { %v2688_v41 = vmul.f32 %v3831_v29, %v3831_v29  ;;  %3277 = vmatpush3.bf16.msra.mxu0 %v3274_v5 }
 0x6e2   :  { %v2693_v20 = vsel %vm35_vm0, %v2689_v21, 0.0 }
 0x6e3   :  { %v2690_v24 = vsel %vm35_vm0, %v2688_v41, 0.0 }
 0x6e4   :  { %2691 = vadd.xlane.f32.xlu0 %v2690_v24 }
 0x6e8   :  { %2694 = vadd.xlane.f32.xlu0 %v2693_v20 }
 0x771   :  { %v2692_v30 = vpop.xlane.xlu0 %2691 }
 0x772   :  { %v2696_v56 = vmul.f32 0.03125, %v2692_v30 }
 0x774   :  { %v2698_v57 = vadd.f32 1e-05, %v2696_v56 }
 0x775   :  { %v2695_v38 = vpop.xlane.xlu0 %2694 }
 0x776   :  { %3324 = vrsqrt.f32 %v2698_v57  ;;  %v2697_v58 = vmul.f32 0.03125, %v2695_v38 }
 0x778   :  { %v2699_v59 = vadd.f32 1e-05, %v2697_v58 }
 0x77a   :  { %3326 = vrsqrt.f32 %v2699_v59 }
 0x780   :  { %v3325_v17 = vpop.eup %3324 }
 0x781   :  { %v2702_v1 = vmul.f32 %v3325_v17, %v3831_v29 }
 0x783   :  { %v2708_v3 = vmul.f32 %v2707_v0, %v2702_v1 }
 0x784   :  { %v3327_v18 = vpop.eup %3326 }
 0x785   :  { %v2703_v61 = vmul.f32 %v3327_v18, %v3829_v15  ;;  %v2714_v16 = vadd.f32 %v2713_v2, %v2708_v3  ;;  %v2825_v15 = vsub.s32 5, %v3428_v9 }
 0x787   :  { %v2709_v4 = vmul.f32 %v2707_v0, %v2703_v61  ;;  %3184 = vmatprep.mubr.msk.f32.mxu1 %vm35_vm0, %v2714_v16  ;;  %v2826_v29 = vrot.slane %v3818_v60, %v2825_v15 }
 0x789   :  { %v2715_v43 = vadd.f32 %v2713_v2, %v2709_v4 }
 0x78b   :  { %3185 = vmatmul.mubr.msk.f32.vlgmr.msra.gmra.mrb[22].mxu1 %vm35_vm0, %v2715_v43 }
 0x85e   :  { %v3186_v51 = vpop.f32.mrb[22].mxu1 }
 0x85f   :  { %v2802_v52 = vadd.f32 %v3186_v51, %v2723_v7  ;;  %v2796_v10 = vpop.f32.mrb[23].mxu1 }
 0x860   :  { %v2797_v12 = vadd.f32 %v2796_v10, %v2723_v7 }
 0x861   :  { %v2806_v14 = vmax.f32 %v2802_v52, 0.0 }
 0x862   :  { %v2805_v13 = vmax.f32 %v2797_v12, 0.0 }
 0x864   :  { %3219 = vmatprep.mubr.f32.mxu0 %v2805_v13 }
 0x865   :  { %3220 = vmatmul.mubr.f32.vlgmr.msra.gmra.mrb[14].mxu0 %v2806_v14 }
 0x938   :  { %v3221_v41 = vpop.f32.mrb[14].mxu0 }
 0x939   :  { %v2899_v24 = vadd.f32 %v3221_v41, %v2826_v29  ;;  %v2893_v21 = vpop.f32.mrb[15].mxu0 }
 0x93a   :  { %v2894_v20 = vadd.f32 %v2893_v21, %v2826_v29 }
 0x93b   :  { %v2903_v46 = vadd.f32 %v2899_v24, %v2715_v43 }
 0x93c   :  { %v2902_v22 = vadd.f32 %v2894_v20, %v2714_v16 }
 0x93d   :  { %v2907_v19 = vsel %vm35_vm0, %v2903_v46, 0.0 }
 0x93e   :  { %2908 = vadd.xlane.f32.xlu0 %v2907_v19  ;;  %v2904_v25 = vsel %vm35_vm0, %v2902_v22, 0.0 }
 0x93f   :  { %2905 = vadd.xlane.f32.xlu1 %v2904_v25 }
 0x9cb   :  { %v2909_v26 = vpop.xlane.xlu0 %2908 }
 0x9cc   :  { %v2911_v45 = vmul.f32 0.03125, %v2909_v26  ;;  %v2906_v27 = vpop.xlane.xlu1 %2905 }
 0x9cd   :  { %v2910_v8 = vmul.f32 0.03125, %v2906_v27 }
 0x9ce   :  { %v2913_v23 = vsub.f32 %v2903_v46, %v2911_v45 }
 0x9cf   :  { %v2912_v28 = vsub.f32 %v2902_v22, %v2910_v8 }
 0x9d0   :  { %v2915_v31 = vmul.f32 %v2913_v23, %v2913_v23 }
 0x9d1   :  { %v2914_v11 = vmul.f32 %v2912_v28, %v2912_v28 }
 0x9d2   :  { %v2919_v32 = vsel %vm35_vm0, %v2915_v31, 0.0 }
 0x9d3   :  { %2920 = vadd.xlane.f32.xlu0 %v2919_v32  ;;  %v2916_v33 = vsel %vm35_vm0, %v2914_v11, 0.0 }
 0x9d4   :  { %2917 = vadd.xlane.f32.xlu1 %v2916_v33 }
 0xa60   :  { %v2921_v34 = vpop.xlane.xlu0 %2920 }
 0xa61   :  { %v2923_v36 = vmul.f32 0.03125, %v2921_v34  ;;  %v2918_v37 = vpop.xlane.xlu1 %2917 }
 0xa62   :  { %v2922_v39 = vmul.f32 0.03125, %v2918_v37 }
 0xa63   :  { %v2925_v40 = vadd.f32 1e-05, %v2923_v36 }
 0xa64   :  { %v2924_v42 = vadd.f32 1e-05, %v2922_v39 }
 0xa65   :  { %3328 = vrsqrt.f32 %v2925_v40 }
 0xa66   :  { %3330 = vrsqrt.f32 %v2924_v42 }
 0xa6f   :  { %v3329_v49 = vpop.eup %3328 }
 0xa70   :  { %v3331_v50 = vpop.eup %3330  ;;  %v2929_v53 = vmul.f32 %v3329_v49, %v2913_v23 }
 0xa71   :  { %v2928_v30 = vmul.f32 %v3331_v50, %v2912_v28 }
 0xa72   :  { %v2935_v56 = vmul.f32 %v2933_v48, %v2929_v53 }
 0xa73   :  { %v2934_v57 = vmul.f32 %v2933_v48, %v2928_v30 }
 0xa74   :  { %v2941_v38 = vadd.f32 %v2939_v55, %v2935_v56 }
 0xa75   :  { %v2940_v58 = vadd.f32 %v2939_v55, %v2934_v57 }
 0xa76   :  { %2943 = vst.msk [vmem:[#allocation2 + $0x8] sm:$0xff] %vm35_vm0, %v2941_v38 }
 0xa77   :  { %2942 = vst.msk [vmem:[#allocation2] sm:$0xff] %vm35_vm0, %v2940_v58 }
 0xa78   :  { %3346 = shalt.err (!%p3343_p4)
}
 0xa79   :  { %s3347_s20 = scalar_lea.hbm %s3940_s6, 256 }
 0xa7a   :  { %p3348_p5 = scmp.ne.s32.totalorder %s3940_s6, %s3347_s20  ;;  %p3351_p6 = scmp.lt.u32.totalorder %s3347_s20, %s3940_s6 }
 0xa7c   :  { %p3353_p7 = pnand %p3351_p6, %p3348_p5 }
 0xa7e   :  { %3356 = shalt.err (!%p3353_p7)
}
 0xa7f   :  { %s3372_s25 = smov 128  }
 0xa80   :  { %2955 = dma.vmem_to_hbm [thread:$0]  %s2950_s17, 256, %s3940_s6, [#allocation3], %s3372_s25, %s3372_s25, %s3368_s15  }
 0xa81   :  { %3357 = dma.done.wait [#allocation3], 256  }
 0xa82   :  { %3358 = vsyncadd [#allocation3], 4294967040 }
 0xa83   :  { %2959 = vsyncpa [#allocation3], 1 }

</bundles_post_ra>
